<compile_context>
chip_gen: v7x
topology: tpu7x:2x2x1
jax: 0.10.0
libtpu: 0.0.40
codegen_flags: <defaults>
</compile_context>

<pallas_src>
import functools
import math

import numpy as np
import jax
import jax.numpy as jnp
from jax.experimental import pallas as pl
from jax.experimental.pallas import tpu as pltpu

POOL_OUT = 100                      # AdaptiveAvgPool1d(100)
HIDDEN = 256                        # nn.Linear(100, 256)
INV_SCALE = 1.0 / math.sqrt(HIDDEN)
TILE_BYTE_CAP = 4 << 20             # per in/out tile cap (v7x: 64 MiB VMEM total)


def adaptive_pool_matrix(t_in, t_out):
    """(t_in, t_out) matrix P so that x @ P == AdaptiveAvgPool1d(t_out)(x)."""
    P = np.zeros((t_in, t_out), dtype=np.float32)
    for i in range(t_out):
        s = (i * t_in) // t_out
        e = ((i + 1) * t_in + t_out - 1) // t_out
        P[s:e, i] = 1.0 / (e - s)
    return jnp.asarray(P)


def _choose_batches_per_step(B, F, T):
    """bb = batches packed per grid step.

    Constraints / preferences:
      * B % bb == 0                      (exact grid)
      * (bb*F) % 8 == 0                  (sublane rule; full block is exempt)
      * bb*F*T*4 <= TILE_BYTE_CAP and bb*F <= 1024   (VMEM / MXU sizing)
      * keep >= 2 grid steps when B >= 2 (v7x: shard across both TensorCores)
    """
    max_rows = max(F, min(1024, TILE_BYTE_CAP // max(T * 4, 1)))
    candidates = [bb for bb in range(1, B + 1)
                  if B % bb == 0 and (bb * F) % 8 == 0]
    if not candidates:
        return B                                   # full-extent block, always legal

    def pick(cands):
        fit = [bb for bb in cands if bb * F <= max_rows]
        return max(fit) if fit else min(cands)

    two_step = [bb for bb in candidates if B // bb >= 2]
    return pick(two_step) if two_step else pick(candidates)


def _vmem_limit_bytes(m_blk, F, T, w_itemsize):
    """Scoped-VMEM budget: double-buffered in/out tiles + weights + temporaries."""
    tile = m_blk * T * 4
    tiles = 2 * 2 * tile                                   # in + out, double-buffered
    weights = 2 * (T * 2 * HIDDEN * w_itemsize) + 2 * 8 * 2 * HIDDEN * 4
    temps = 2 * tile + 3 * m_blk * 2 * HIDDEN * 4 + 4 * m_blk * F * 4
    need = tiles + weights + temps
    return int(min(max(2 * need, 16 << 20), 48 << 20))


def _freq_self_att_kernel(inp_ref, w_ref, b_ref, out_ref, *, bb, f):
    m = bb * f
    inp = inp_ref[...]                                                  # (m, T) f32

    # Fused pooled key|query projection: one MXU matmul with m = bb*f rows.
    # (1/sqrt(256) is pre-folded into the query half of w/b.)
    x = inp.astype(w_ref.dtype)
    kq = jnp.dot(x, w_ref[...],
                 preferred_element_type=jnp.float32) + b_ref[...]       # (m, 2H)
    kq3 = kq.reshape(bb, f, 2 * HIDDEN)
    key = kq3[:, :, :HIDDEN]                                            # (bb,f,H)
    query = kq3[:, :, HIDDEN:]                                          # (bb,f,H)

    # Per-batch attention scores, softmax over the last (freq) axis.
    scores = jnp.einsum("bik,bjk->bij", key, query,
                        preferred_element_type=jnp.float32)             # (bb,f,f)
    scores = scores - jnp.max(scores, axis=-1, keepdims=True)
    e = jnp.exp(scores)
    att = e / jnp.sum(e, axis=-1, keepdims=True)

    # fw = mean_T(att @ inp) == att @ mean_T(inp)   (linearity of the mean).
    rowmean = jnp.mean(inp, axis=-1, keepdims=True)                     # (m, 1)
    rm = rowmean.reshape(bb, 1, f)
    fw = jnp.sum(att * rm, axis=-1)                                     # (bb, f)

    # Min-max normalize over the freq axis per batch (NormalizeData_1dim + 1e-6).
    # NOTE: like the PyTorch reference, this divides by zero if fw is constant.
    mi = jnp.min(fw, axis=-1, keepdims=True)
    ma = jnp.max(fw, axis=-1, keepdims=True)
    fw_n = (fw - mi) / (ma - mi) + 1e-6                                 # (bb, f)

    out_ref[...] = inp * fw_n.reshape(m, 1)


def freq_self_att_weight(inp, wk, bk, wq, bq, *, matmul_dtype=jnp.float32):
    B, F, T = inp.shape
    inp = inp.astype(jnp.float32)

    # Fold the adaptive pool into the linears, fuse key|query, fold 1/sqrt(256)
    # into the query half.  PyTorch nn.Linear biases may be (H,) -> reshape.
    P = adaptive_pool_matrix(T, POOL_OUT)                               # (T, 100)
    wk2 = P @ jnp.asarray(wk, jnp.float32)
    wq2 = (P @ jnp.asarray(wq, jnp.float32)) * INV_SCALE
    w_fused = jnp.concatenate([wk2, wq2], axis=1).astype(matmul_dtype)  # (T, 512)
    b_fused = jnp.concatenate(
        [jnp.reshape(jnp.asarray(bk, jnp.float32), (1, -1)),
         jnp.reshape(jnp.asarray(bq, jnp.float32), (1, -1)) * INV_SCALE],
        axis=1)                                                         # (1, 512)

    x2 = inp.reshape(B * F, T)

    bb = _choose_batches_per_step(B, F, T)
    m_blk = bb * F
    grid = (B // bb,)
    vmem_limit = _vmem_limit_bytes(m_blk, F, T, jnp.dtype(matmul_dtype).itemsize)

    kernel = functools.partial(_freq_self_att_kernel, bb=bb, f=F)

    def _call(resident_weights):
        if resident_weights:
            # Constant index_map -> single-buffer the resident operands.
            w_spec = pl.BlockSpec((T, 2 * HIDDEN), lambda i: (0, 0),
                                  pipeline_mode=pl.Buffered(1))
            b_spec = pl.BlockSpec((1, 2 * HIDDEN), lambda i: (0, 0),
                                  pipeline_mode=pl.Buffered(1))
        else:
            w_spec = pl.BlockSpec((T, 2 * HIDDEN), lambda i: (0, 0))
            b_spec = pl.BlockSpec((1, 2 * HIDDEN), lambda i: (0, 0))
        return pl.pallas_call(
            kernel,
            out_shape=jax.ShapeDtypeStruct((B * F, T), jnp.float32),
            grid_spec=pltpu.PrefetchScalarGridSpec(
                num_scalar_prefetch=0,
                grid=grid,
                in_specs=[
                    pl.BlockSpec((m_blk, T), lambda i: (i, 0)),   # packed input rows
                    w_spec,                                       # fused weights (resident)
                    b_spec,                                       # fused bias   (resident)
                ],
                out_specs=pl.BlockSpec((m_blk, T), lambda i: (i, 0)),
            ),
            compiler_params=pltpu.CompilerParams(
                dimension_semantics=("parallel",),                # v7x: shard across TCs
                vmem_limit_bytes=vmem_limit),
        )(x2, w_fused, b_fused)

    try:
        out2 = _call(True)
    except Exception:
        # Defensive fallback if single-buffered resident operands are rejected.
        out2 = _call(False)

    return out2.reshape(B, F, T)


def _reference(inp, wk, bk, wq, bq):
    """Pure-JAX reference mirroring the PyTorch forward (pool -> linears -> att)."""
    B, F, T = inp.shape
    P = adaptive_pool_matrix(T, POOL_OUT)
    x = jnp.einsum("bft,to->bfo", inp, P)
    key = x @ wk + jnp.reshape(bk, (1, -1))
    query = x @ wq + jnp.reshape(bq, (1, -1))
    scores = jnp.einsum("bik,bjk->bij", key, query) / math.sqrt(HIDDEN)
    att = jax.nn.softmax(scores, axis=2)
    cat = jnp.einsum("bif,bft->bit", att, inp)
    fw = jnp.mean(cat, axis=2, keepdims=True)
    mi = jnp.min(fw, axis=1, keepdims=True)
    ma = jnp.max(fw, axis=1, keepdims=True)
    fw_n = (fw - mi) / (ma - mi) + 1e-6
    return inp * fw_n


if __name__ == "__main__":
    key0 = jax.random.PRNGKey(0)
    kx, kwk, kbk, kwq, kbq = jax.random.split(key0, 5)

    B, F, T = 2, 16, 200   # small batch / freq bins; T pooled down to 100
    inp = jax.random.normal(kx, (B, F, T), dtype=jnp.float32)

    # nn.Linear(100, 256) init: U(-1/sqrt(100), 1/sqrt(100)); weight stored as
    # (in, out), bias as (H,) like a real PyTorch checkpoint.
    bound = 1.0 / math.sqrt(POOL_OUT)
    wk = jax.random.uniform(kwk, (POOL_OUT, HIDDEN), jnp.float32, -bound, bound)
    bk = jax.random.uniform(kbk, (HIDDEN,), jnp.float32, -bound, bound)
    wq = jax.random.uniform(kwq, (POOL_OUT, HIDDEN), jnp.float32, -bound, bound)
    bq = jax.random.uniform(kbq, (HIDDEN,), jnp.float32, -bound, bound)

    # Strict check: f32 MXU path vs pure-JAX reference.
    out = freq_self_att_weight(inp, wk, bk, wq, bq)
    jax.block_until_ready(out)
    ref = _reference(inp, wk, bk, wq, bq)
    np.testing.assert_allclose(np.asarray(out), np.asarray(ref),
                               rtol=2e-3, atol=2e-3)

    # Exercise the bf16-weight MXU path (faster / half weight VMEM).  Not part
    # of the strict tolerance check: the 1/(ma-mi) min-max normalize amplifies
    # tiny projection errors at these very small demo shapes.
    out_bf16 = freq_self_att_weight(inp, wk, bk, wq, bq,
                                    matmul_dtype=jnp.bfloat16)
    jax.block_until_ready(out_bf16)
    assert bool(jnp.all(jnp.isfinite(out_bf16)))

    print("KERNEL_OK")
</pallas_src>

<mosaic_0001>
module attributes {stable_mosaic.version = 11 : i64} {
  func.func @_freq_self_att_kernel(%arg0: i32, %arg1: memref<16x200xf32, #tpu.memory_space<vmem>>, %arg2: memref<200x512xf32, #tpu.memory_space<vmem>>, %arg3: memref<1x512xf32, #tpu.memory_space<vmem>>, %arg4: memref<16x200xf32, #tpu.memory_space<vmem>>) attributes {dimension_semantics = [#tpu.dimension_semantics<parallel>], iteration_bounds = array<i64: 2>, scalar_prefetch = 0 : i64, scratch_operands = 0 : i64, tpu.core_type = #tpu.core_type<tc>, window_params = [{transform_indices = @transform_0, window_bounds = array<i64: 16, 200>}, {pipeline_mode = #tpu.pipeline_mode<synchronous>, transform_indices = @transform_1, window_bounds = array<i64: 200, 512>}, {pipeline_mode = #tpu.pipeline_mode<synchronous>, transform_indices = @transform_2, window_bounds = array<i64: 1, 512>}, {transform_indices = @transform_3, window_bounds = array<i64: 16, 200>}]} {
    %c0 = arith.constant 0 : index
    %c0_0 = arith.constant 0 : index
    %0 = vector.load %arg1[%c0, %c0_0] : memref<16x200xf32, #tpu.memory_space<vmem>>, vector<16x200xf32>
    %c0_1 = arith.constant 0 : index
    %c0_2 = arith.constant 0 : index
    %1 = vector.load %arg2[%c0_1, %c0_2] : memref<200x512xf32, #tpu.memory_space<vmem>>, vector<200x512xf32>
    %cst = arith.constant dense<0.000000e+00> : vector<16x512xf32>
    %2 = tpu.matmul %0, %1, %cst {dimension_numbers = #tpu.dot_dimension_numbers<[1], [0], [0], [1], [0, 0, 1, 1], [], []>} : vector<16x200xf32>, vector<200x512xf32>, vector<16x512xf32> -> vector<16x512xf32>
    %c0_3 = arith.constant 0 : index
    %c0_4 = arith.constant 0 : index
    %3 = vector.load %arg3[%c0_3, %c0_4] : memref<1x512xf32, #tpu.memory_space<vmem>>, vector<1x512xf32>
    %4 = vector.broadcast %3 : vector<1x512xf32> to vector<16x512xf32>
    %5 = arith.addf %2, %4 : vector<16x512xf32>
    %6 = vector.shape_cast %5 : vector<16x512xf32> to vector<1x16x512xf32>
    %7 = vector.extract_strided_slice %6 {offsets = [0, 0, 0], sizes = [1, 16, 256], strides = [1, 1, 1]} : vector<1x16x512xf32> to vector<1x16x256xf32>
    %8 = vector.extract_strided_slice %6 {offsets = [0, 0, 256], sizes = [1, 16, 256], strides = [1, 1, 1]} : vector<1x16x512xf32> to vector<1x16x256xf32>
    "tpu.trace_start"() <{level = 10 : i32, message = "bik,bjk->bij"}> : () -> ()
    %cst_5 = arith.constant dense<0.000000e+00> : vector<1x16x16xf32>
    %9 = tpu.matmul %7, %8, %cst_5 {dimension_numbers = #tpu.dot_dimension_numbers<[2], [2], [1], [1], [0, 0, 0, 1, 1, 1], [0], [0]>} : vector<1x16x256xf32>, vector<1x16x256xf32>, vector<1x16x16xf32> -> vector<1x16x16xf32>
    "tpu.trace_stop"() : () -> ()
    %cst_6 = arith.constant dense<0xFF800000> : vector<1x16xf32>
    %10 = vector.multi_reduction <maximumf>, %9, %cst_6 [2] : vector<1x16x16xf32> to vector<1x16xf32>
    %11 = vector.shape_cast %10 : vector<1x16xf32> to vector<1x16x1xf32>
    %12 = vector.broadcast %11 : vector<1x16x1xf32> to vector<1x16x16xf32>
    %13 = arith.subf %9, %12 : vector<1x16x16xf32>
    %14 = math.exp %13 : vector<1x16x16xf32>
    %cst_7 = arith.constant dense<0.000000e+00> : vector<1x16xf32>
    %15 = vector.multi_reduction <add>, %14, %cst_7 [2] : vector<1x16x16xf32> to vector<1x16xf32>
    %16 = vector.shape_cast %15 : vector<1x16xf32> to vector<1x16x1xf32>
    %17 = vector.broadcast %16 : vector<1x16x1xf32> to vector<1x16x16xf32>
    %18 = arith.divf %14, %17 : vector<1x16x16xf32>
    %cst_8 = arith.constant dense<0.000000e+00> : vector<16xf32>
    %19 = vector.multi_reduction <add>, %0, %cst_8 [1] : vector<16x200xf32> to vector<16xf32>
    %20 = vector.shape_cast %19 : vector<16xf32> to vector<16x1xf32>
    %cst_9 = arith.constant 2.000000e+02 : f32
    %21 = vector.broadcast %cst_9 : f32 to vector<16x1xf32>
    %22 = arith.divf %20, %21 : vector<16x1xf32>
    %23 = vector.shape_cast %22 : vector<16x1xf32> to vector<1x1x16xf32>
    %24 = vector.broadcast %23 : vector<1x1x16xf32> to vector<1x16x16xf32>
    %25 = arith.mulf %18, %24 : vector<1x16x16xf32>
    %cst_10 = arith.constant dense<0.000000e+00> : vector<1x16xf32>
    %26 = vector.multi_reduction <add>, %25, %cst_10 [2] : vector<1x16x16xf32> to vector<1x16xf32>
    %cst_11 = arith.constant dense<0x7F800000> : vector<1xf32>
    %27 = vector.multi_reduction <minimumf>, %26, %cst_11 [1] : vector<1x16xf32> to vector<1xf32>
    %28 = vector.shape_cast %27 : vector<1xf32> to vector<1x1xf32>
    %cst_12 = arith.constant dense<0xFF800000> : vector<1xf32>
    %29 = vector.multi_reduction <maximumf>, %26, %cst_12 [1] : vector<1x16xf32> to vector<1xf32>
    %30 = vector.shape_cast %29 : vector<1xf32> to vector<1x1xf32>
    %31 = vector.broadcast %28 : vector<1x1xf32> to vector<1x16xf32>
    %32 = arith.subf %26, %31 : vector<1x16xf32>
    %33 = arith.subf %30, %28 : vector<1x1xf32>
    %34 = vector.broadcast %33 : vector<1x1xf32> to vector<1x16xf32>
    %35 = arith.divf %32, %34 : vector<1x16xf32>
    %cst_13 = arith.constant 9.99999997E-7 : f32
    %36 = vector.broadcast %cst_13 : f32 to vector<1x16xf32>
    %37 = arith.addf %35, %36 : vector<1x16xf32>
    %38 = vector.shape_cast %37 : vector<1x16xf32> to vector<16x1xf32>
    %39 = vector.broadcast %38 : vector<16x1xf32> to vector<16x200xf32>
    %40 = arith.mulf %0, %39 : vector<16x200xf32>
    %c0_14 = arith.constant 0 : index
    %c0_15 = arith.constant 0 : index
    %41 = vector.load %arg4[%c0_14, %c0_15] : memref<16x200xf32, #tpu.memory_space<vmem>>, vector<16x200xf32>
    tpu.vector_store %arg4[%c0_14, %c0_15], %40 {strides = array<i32>} : memref<16x200xf32, #tpu.memory_space<vmem>>, vector<16x200xf32>,
    return
  }
  func.func @transform_0(%arg0: i32) -> (i32, i32) {
    %c0_i32 = arith.constant 0 : i32
    %c0_i32_0 = arith.constant 0 : i32
    return %arg0, %c0_i32 : i32, i32
  }
  func.func @transform_1(%arg0: i32) -> (i32, i32) {
    %c0_i32 = arith.constant 0 : i32
    %c0_i32_0 = arith.constant 0 : i32
    %c0_i32_1 = arith.constant 0 : i32
    return %c0_i32, %c0_i32_0 : i32, i32
  }
  func.func @transform_2(%arg0: i32) -> (i32, i32) {
    %c0_i32 = arith.constant 0 : i32
    %c0_i32_0 = arith.constant 0 : i32
    %c0_i32_1 = arith.constant 0 : i32
    return %c0_i32, %c0_i32_0 : i32, i32
  }
  func.func @transform_3(%arg0: i32) -> (i32, i32) {
    %c0_i32 = arith.constant 0 : i32
    %c0_i32_0 = arith.constant 0 : i32
    return %arg0, %c0_i32 : i32, i32
  }
}

module attributes {stable_mosaic.version = 11 : i64} {
  func.func @_freq_self_att_kernel(%arg0: i32, %arg1: memref<16x200xf32, #tpu.memory_space<vmem>>, %arg2: memref<200x512xf32, #tpu.memory_space<vmem>>, %arg3: memref<1x512xf32, #tpu.memory_space<vmem>>, %arg4: memref<16x200xf32, #tpu.memory_space<vmem>>) attributes {dimension_semantics = [#tpu.dimension_semantics<parallel>], iteration_bounds = array<i64: 2>, scalar_prefetch = 0 : i64, scratch_operands = 0 : i64, tpu.core_type = #tpu.core_type<tc>, window_params = [{transform_indices = @transform_0, window_bounds = array<i64: 16, 200>}, {pipeline_mode = #tpu.pipeline_mode<synchronous>, transform_indices = @transform_1, window_bounds = array<i64: 200, 512>}, {pipeline_mode = #tpu.pipeline_mode<synchronous>, transform_indices = @transform_2, window_bounds = array<i64: 1, 512>}, {transform_indices = @transform_3, window_bounds = array<i64: 16, 200>}]} {
    %c0 = arith.constant 0 : index
    %c0_0 = arith.constant 0 : index
    %0 = vector.load %arg1[%c0, %c0_0] : memref<16x200xf32, #tpu.memory_space<vmem>>, vector<16x200xf32>
    %c0_1 = arith.constant 0 : index
    %c0_2 = arith.constant 0 : index
    %1 = vector.load %arg2[%c0_1, %c0_2] : memref<200x512xf32, #tpu.memory_space<vmem>>, vector<200x512xf32>
    %cst = arith.constant dense<0.000000e+00> : vector<16x512xf32>
    %2 = tpu.matmul %0, %1, %cst {dimension_numbers = #tpu.dot_dimension_numbers<[1], [0], [0], [1], [0, 0, 1, 1], [], []>} : vector<16x200xf32>, vector<200x512xf32>, vector<16x512xf32> -> vector<16x512xf32>
    %c0_3 = arith.constant 0 : index
    %c0_4 = arith.constant 0 : index
    %3 = vector.load %arg3[%c0_3, %c0_4] : memref<1x512xf32, #tpu.memory_space<vmem>>, vector<1x512xf32>
    %4 = vector.broadcast %3 : vector<1x512xf32> to vector<16x512xf32>
    %5 = arith.addf %2, %4 : vector<16x512xf32>
    %6 = vector.shape_cast %5 : vector<16x512xf32> to vector<1x16x512xf32>
    %7 = vector.extract_strided_slice %6 {offsets = [0, 0, 0], sizes = [1, 16, 256], strides = [1, 1, 1]} : vector<1x16x512xf32> to vector<1x16x256xf32>
    %8 = vector.extract_strided_slice %6 {offsets = [0, 0, 256], sizes = [1, 16, 256], strides = [1, 1, 1]} : vector<1x16x512xf32> to vector<1x16x256xf32>
    "tpu.trace_start"() <{level = 10 : i32, message = "bik,bjk->bij"}> : () -> ()
    %cst_5 = arith.constant dense<0.000000e+00> : vector<1x16x16xf32>
    %9 = tpu.matmul %7, %8, %cst_5 {dimension_numbers = #tpu.dot_dimension_numbers<[2], [2], [1], [1], [0, 0, 0, 1, 1, 1], [0], [0]>} : vector<1x16x256xf32>, vector<1x16x256xf32>, vector<1x16x16xf32> -> vector<1x16x16xf32>
    "tpu.trace_stop"() : () -> ()
    %cst_6 = arith.constant dense<0xFF800000> : vector<1x16xf32>
    %10 = vector.multi_reduction <maximumf>, %9, %cst_6 [2] : vector<1x16x16xf32> to vector<1x16xf32>
    %11 = vector.shape_cast %10 : vector<1x16xf32> to vector<1x16x1xf32>
    %12 = vector.broadcast %11 : vector<1x16x1xf32> to vector<1x16x16xf32>
    %13 = arith.subf %9, %12 : vector<1x16x16xf32>
    %14 = math.exp %13 : vector<1x16x16xf32>
    %cst_7 = arith.constant dense<0.000000e+00> : vector<1x16xf32>
    %15 = vector.multi_reduction <add>, %14, %cst_7 [2] : vector<1x16x16xf32> to vector<1x16xf32>
    %16 = vector.shape_cast %15 : vector<1x16xf32> to vector<1x16x1xf32>
    %17 = vector.broadcast %16 : vector<1x16x1xf32> to vector<1x16x16xf32>
    %18 = arith.divf %14, %17 : vector<1x16x16xf32>
    %cst_8 = arith.constant dense<0.000000e+00> : vector<16xf32>
    %19 = vector.multi_reduction <add>, %0, %cst_8 [1] : vector<16x200xf32> to vector<16xf32>
    %20 = vector.shape_cast %19 : vector<16xf32> to vector<16x1xf32>
    %cst_9 = arith.constant 2.000000e+02 : f32
    %21 = vector.broadcast %cst_9 : f32 to vector<16x1xf32>
    %22 = arith.divf %20, %21 : vector<16x1xf32>
    %23 = vector.shape_cast %22 : vector<16x1xf32> to vector<1x1x16xf32>
    %24 = vector.broadcast %23 : vector<1x1x16xf32> to vector<1x16x16xf32>
    %25 = arith.mulf %18, %24 : vector<1x16x16xf32>
    %cst_10 = arith.constant dense<0.000000e+00> : vector<1x16xf32>
    %26 = vector.multi_reduction <add>, %25, %cst_10 [2] : vector<1x16x16xf32> to vector<1x16xf32>
    %cst_11 = arith.constant dense<0x7F800000> : vector<1xf32>
    %27 = vector.multi_reduction <minimumf>, %26, %cst_11 [1] : vector<1x16xf32> to vector<1xf32>
    %28 = vector.shape_cast %27 : vector<1xf32> to vector<1x1xf32>
    %cst_12 = arith.constant dense<0xFF800000> : vector<1xf32>
    %29 = vector.multi_reduction <maximumf>, %26, %cst_12 [1] : vector<1x16xf32> to vector<1xf32>
    %30 = vector.shape_cast %29 : vector<1xf32> to vector<1x1xf32>
    %31 = vector.broadcast %28 : vector<1x1xf32> to vector<1x16xf32>
    %32 = arith.subf %26, %31 : vector<1x16xf32>
    %33 = arith.subf %30, %28 : vector<1x1xf32>
    %34 = vector.broadcast %33 : vector<1x1xf32> to vector<1x16xf32>
    %35 = arith.divf %32, %34 : vector<1x16xf32>
    %cst_13 = arith.constant 9.99999997E-7 : f32
    %36 = vector.broadcast %cst_13 : f32 to vector<1x16xf32>
    %37 = arith.addf %35, %36 : vector<1x16xf32>
    %38 = vector.shape_cast %37 : vector<1x16xf32> to vector<16x1xf32>
    %39 = vector.broadcast %38 : vector<16x1xf32> to vector<16x200xf32>
    %40 = arith.mulf %0, %39 : vector<16x200xf32>
    %c0_14 = arith.constant 0 : index
    %c0_15 = arith.constant 0 : index
    %41 = vector.load %arg4[%c0_14, %c0_15] : memref<16x200xf32, #tpu.memory_space<vmem>>, vector<16x200xf32>
    tpu.vector_store %arg4[%c0_14, %c0_15], %40 {strides = array<i32>} : memref<16x200xf32, #tpu.memory_space<vmem>>, vector<16x200xf32>,
    return
  }
  func.func @transform_0(%arg0: i32) -> (i32, i32) {
    %c0_i32 = arith.constant 0 : i32
    %c0_i32_0 = arith.constant 0 : i32
    return %arg0, %c0_i32 : i32, i32
  }
  func.func @transform_1(%arg0: i32) -> (i32, i32) {
    %c0_i32 = arith.constant 0 : i32
    %c0_i32_0 = arith.constant 0 : i32
    %c0_i32_1 = arith.constant 0 : i32
    return %c0_i32, %c0_i32_0 : i32, i32
  }
  func.func @transform_2(%arg0: i32) -> (i32, i32) {
    %c0_i32 = arith.constant 0 : i32
    %c0_i32_0 = arith.constant 0 : i32
    %c0_i32_1 = arith.constant 0 : i32
    return %c0_i32, %c0_i32_0 : i32, i32
  }
  func.func @transform_3(%arg0: i32) -> (i32, i32) {
    %c0_i32 = arith.constant 0 : i32
    %c0_i32_0 = arith.constant 0 : i32
    return %arg0, %c0_i32 : i32, i32
  }
}

</mosaic_0001>

<bundles_post_ra>
// kernel: tpu_custom_call.1
= control target key start
LH: loop header
LB: loop body
LE: loop exit
PB: predicated region body
PF: predicated region fallthrough
CT: control target
= control target key end

     0   :  { %8 = vsyncpa [#allocation3], 0  ;;  %s1389_s0 = inlined_call_operand.hbm [shape: f32[32,200], index: 0, kind: input, shape index: {}]   ;;  %s1390_s1 = inlined_call_operand.hbm [shape: f32[200,512], index: 1, kind: input, shape index: {}]   ;;  %s1391_s2 = inlined_call_operand.vmem [shape: f32[1,512], index: 2, kind: input, shape index: {}]   ;;  %s1392_s3 = inlined_call_operand.hbm [shape: f32[32,200], index: 3, kind: output, shape index: {}]  }
   0x1   :  { %10 = vsyncpa [#allocation3 + $0x1], 0 }
   0x2   :  { %11 = vsyncpa [#allocation6], 0 }
   0x3   :  { %12 = vsyncpa [#allocation4], 0 }
   0x4   :  { %14 = vsyncpa [#allocation4 + $0x1], 0  ;;  %s1127_s12 = smov 0   ;;  %s1129_s13 = smov 0  }
   0x5   :  { %s1131_s14 = smov 0   ;;  %s1133_s15 = smov 0  }
   0x6 LB: > { %s1148_s16 = sadd.s32 4294967295, %s1096_s15   ;;  %s767_s17 = sadd.s32 4294967294, %s1096_s15   ;;  %s1096_s15 = sphi %s1133_s15, %s1412_s15   ;;  %s1092_s14 = sphi %s1131_s14, %s1411_s14   ;;  %s1088_s13 = sphi %s1129_s13, %s1410_s13   ;;  %s1084_s12 = sphi %s1127_s12, %s1409_s12  }
   0x7   : > { %p40_p0 = scmp.ne.s32.totalorder %s1088_s13, %s1084_s12  ;;  %p1393_p1 = scmp.eq.s32.totalorder %s1148_s16, 0 }
   0x8   : > { %p112_p3 = scmp.eq.s32.totalorder %s767_s17, 1  ;;  %p768_p5 = scmp.ge.s32.totalorder %s1096_s15, 1 }
   0x9   : > { %p1157_p4 = por %p1393_p1, %p40_p0  ;;  %p119_p7 = scmp.lt.s32.totalorder %s1096_s15, 3 }
   0xa   : > { %p1162_p6 = por %p112_p3, %p40_p0  ;;  %s1098_s21 = smov [#allocation5]  }
   0xb   : > { %s1396_s18 = scalar_select %p1157_p4, 1, 0 }
   0xc   : > { %s1397_s19 = scalar_select %p1162_p6, 1, 0 }
   0xd   : > { %p1167_p8 = pnand %p768_p5, %p119_p7  ;;  %s131_s22 = sshll.u32 %s1098_s21, 4  ;;  %s1171_s22 = int_to_ptr.vmem [resolvable:$true] %s131_s22 }
   0xe   : > { %s1183_s24 = sadd.s32 1, %s1096_s15   ;;  %s27_s25 = sadd.s32 1, %s1092_s14 }
   0xf   : > { %s1398_s20 = scalar_select %p1167_p8, 1, 0 }
  0x10   : > { %p903_p9 = pneg %p1167_p8  ;;  %s24_s26 = ssub.s32 %s1096_s15, %s1183_s24 }
  0x11   : > { %s968_s29 = scalar_lea.hbm %s1390_s1, 12800 }
  0x12   : > { %p1178_p11 = pnand %p903_p9, %p1393_p1  ;;  %p969_p12 = scmp.ne.s32.totalorder %s1390_s1, %s968_s29 }
  0x13   : > { %p975_p5 = scmp.lt.u32.totalorder %s968_s29, %s1390_s1 }
  0x14   : > { %p970_p13 = pneg %p1178_p11 }
  0x16   : > { %p971_p0 = pnand %p970_p13, %p969_p12 }
  0x18   : > { %p972_p3 = pneg %p971_p0 }
  0x1a   : > { %p977_p7 = pnand %p975_p5, %p972_p3 }
  0x1c   : > { %980 = shalt.err (!%p977_p7)
}
  0x1d   : > { %s981_s7 = scalar_lea.vmem %s1171_s22, 12800  ;;  %p989_p2 = scmp.lt.s32.totalorder %s1171_s22, %s1171_s22 }
  0x1e   : > { %p982_p9 = scmp.ne.s32.totalorder %s1171_s22, %s981_s7  ;;  %p990_p6 = scmp.lt.s32.totalorder %s981_s7, %s981_s7 }
  0x20   : > { %p984_p10 = pnand %p982_p9, %p970_p13  ;;  %p991_p4 = por %p990_p6, %p989_p2 }
  0x22   : > { %p985_p1 = pneg %p984_p10 }
  0x24   : > { %p992_p8 = pnand %p991_p4, %p985_p1 }
  0x26   : > { %995 = shalt.err (!%p992_p8)
}
  0x27   : > { %s1099_s8 = smov 512   ;;  %s1100_s9 = smov 32  }
  0x28   : > { %906 = dma.hbm_to_vmem [thread:$0]  (!%p1178_p11), %s1390_s1, 12800, %s1171_s22, [#allocation6], %s1099_s8, %s1099_s8, %s1100_s9  }
  0x29   : > { %p25_p2 = scmp.eq.s32.totalorder %s24_s26, 0  ;;  %p34_p1 = scmp.ne.s32.totalorder %s1092_s14, %s1088_s13 }
  0x2a   : > { %p35_p4 = scmp.eq.s32.totalorder %s1096_s15, 0  ;;  %p916_p6 = scmp.lt.s32.totalorder %s1096_s15, 2 }
  0x2b   : > { %s1214_s17 = scalar_select %p25_p2, %s1092_s14, %s27_s25  }
  0x2c   : > { %p36_p8 = por %p35_p4, %p34_p1  ;;  %p1400_p10 = scmp.eq.s32.totalorder %s1148_s16, 1 }
  0x2d   : > { %s148_s27 = sand.u32 1, %s1092_s14   ;;  %s790_s28 = sshll.u32 %s1096_s15, 9 }
  0x2e   : > { %p1218_p12 = por %p1400_p10, %p34_p1  ;;  %s771_s29 = sshll.u32 %s148_s27, 5 }
  0x2f   : > { %s1227_s4 = scalar_lea.hbm %s1389_s0, %s790_s28  ;;  %s152_s22 = scalar_lea.vmem [#allocation2], %s771_s29 }
  0x30   : > { %s160_s25 = sshll.u32 %s152_s22, 4  ;;  %p1229_p11 = pnand %p916_p6, %p36_p8  ;;  %s1233_s25 = int_to_ptr.vmem [resolvable:$true] %s160_s25 }
  0x31   : > { %s1235_s5 = scalar_lea.sflag [#allocation3], %s148_s27  ;;  %s996_s6 = scalar_lea.hbm %s1227_s4, 512 }
  0x32   : > { %p997_p13 = scmp.ne.s32.totalorder %s1227_s4, %s996_s6  ;;  %p998_p0 = pneg %p1229_p11 }
  0x33   : > { %s1001_s9 = scalar_lea.hbm %s1389_s0, 1024  ;;  %p1002_p7 = scmp.lt.u32.totalorder %s1227_s4, %s1389_s0 }
  0x34   : > { %p999_p3 = pnand %p998_p0, %p997_p13  ;;  %p1003_p9 = scmp.lt.u32.totalorder %s1001_s9, %s996_s6 }
  0x35   : > { %p1005_p1 = scmp.lt.u32.totalorder %s996_s6, %s1227_s4 }
  0x36   : > { %p1000_p5 = pneg %p999_p3  ;;  %p1004_p2 = por %p1003_p9, %p1002_p7 }
  0x38   : > { %p1006_p4 = por %p1005_p1, %p1004_p2 }
  0x3a   : > { %p1007_p6 = pnand %p1006_p4, %p1000_p5 }
  0x3c   : > { %1010 = shalt.err (!%p1007_p6)
}
  0x3d   : > { %s1011_s27 = scalar_lea.vmem %s1233_s25, 512  ;;  %s1101_s28 = smov [#allocation2]  }
  0x3e   : > { %p1012_p8 = scmp.ne.s32.totalorder %s1233_s25, %s1011_s27  ;;  %s1016_s29 = sshll.u32 %s1101_s28, 4  ;;  %s1017_s29 = int_to_ptr.vmem [resolvable:$false] %s1016_s29 }
  0x3f   : > { %s1018_s23 = scalar_lea.vmem %s1017_s29, 1024  ;;  %p1019_p3 = scmp.lt.s32.totalorder %s1233_s25, %s1017_s29 }
  0x40   : > { %p1014_p10 = pnand %p1012_p8, %p998_p0  ;;  %p1020_p7 = scmp.lt.s32.totalorder %s1018_s23, %s1011_s27 }
  0x42   : > { %p1015_p13 = pneg %p1014_p10  ;;  %p1021_p9 = por %p1020_p7, %p1019_p3 }
  0x44   : > { %p1022_p2 = pnand %p1021_p9, %p1015_p13 }
  0x46   : > { %1025 = shalt.err (!%p1022_p2)
}
  0x47   : > { %s1102_s30 = smov 256   ;;  %s1103_s22 = smov 16  }
  0x48   : > { %910 = dma.hbm_to_vmem [thread:$0]  (!%p1229_p11), %s1227_s4, 512, %s1233_s25, %s1235_s5, %s1102_s30, %s1102_s30, %s1103_s22  }
  0x49   : > { %p1403_p0 = scmp.ne.s32.totalorder %s1398_s20, 0 }
  0x4a   : > { %s1266_s6 = sand.u32 (!%p1403_p0), 1, %s1088_s13   ;;  %p1404_p5 = scmp.ne.s32.totalorder (!%p1403_p0), %s1396_s18, 0 }
  0x4b   : > { %172 = sbr.rel (%p1403_p0) target bundleno = 1093 (0x445), region = 32  ;;  %s776_s7 = sshll.u32 (!%p1403_p0), %s1266_s6, 5 }
  0x4c   : > { %s175_s8 = scalar_lea.sflag (!%p1403_p0), [#allocation3], %s1266_s6  ;;  %s1272_s9 = scalar_lea.vmem (!%p1403_p0), [#allocation2], %s776_s7 }
  0x52   : > { %1071 = dma.done.wait (%p1404_p5), %s175_s8, 512  }
  0x53   : > { %1073 = vsyncadd (%p1404_p5), %s175_s8, 4294966784  ;;  %p1405_p11 = scmp.eq.s32.totalorder %s1148_s16, 0 }
  0x55   : > { %1075 = dma.done.wait (%p1405_p11), [#allocation6], 12800   ;;  %p1406_p1 = pmov %p1405_p11 }
  0x56   : > { %v214_v0 = vld [vmem:[#allocation5 + $0x18] sm:$0xff]  ;;  %v213_v2 = vld [vmem:[#allocation5 + $0x10] sm:$0xff]  ;;  %v212_v14 = vld [vmem:[#allocation5 + $0x8] sm:$0xff]  ;;  %vm333_vm0 = vcmask 588800   ;;  %vm569_vm1 = vcmask 130048   ;;  %vm616_vm2 = vcmask 130112  }
  0x57   : > { %1077 = vsyncadd (%p1406_p1), [#allocation6], 4294954496  ;;  %v218_v1 = vld [vmem:[#allocation5 + $0x38] sm:$0xff]  ;;  %v217_v4 = vld [vmem:[#allocation5 + $0x30] sm:$0xff]  ;;  %s204_s4 = scalar_lea.vmem [#allocation7], %s776_s7  ;;  %s792_s26 = sshll.u32 %s1148_s16, 9 }
  0x58   : > { %v841_v3 = vpack.c.bf16 %v218_v1, %v214_v0  ;;  %v222_v5 = vld [vmem:[#allocation5 + $0x58] sm:$0xff]  ;;  %v843_v7 = vpack.c.bf16 %v217_v4, %v213_v2  ;;  %v221_v9 = vld [vmem:[#allocation5 + $0x50] sm:$0xff]  ;;  %v216_v15 = vld [vmem:[#allocation5 + $0x28] sm:$0xff]  ;;  %s684_s25 = sshll.u32 %s204_s4, 4  ;;  %s1339_s11 = scalar_lea.hbm %s1392_s3, %s792_s26  ;;  %s1334_s25 = int_to_ptr.vmem [resolvable:$true] %s684_s25 }
  0x59   : > { %v226_v6 = vld [vmem:[#allocation5 + $0x78] sm:$0xff]  ;;  %v225_v10 = vld [vmem:[#allocation5 + $0x70] sm:$0xff]  ;;  %v211_v16 = vld [vmem:[#allocation5] sm:$0xff]  ;;  %v793_v20 = vpack.c.bf16 %v216_v15, %v212_v14  ;;  %s670_s16 = scalar_lea.sflag [#allocation4], %s1266_s6  ;;  %s1026_s27 = scalar_lea.vmem %s1334_s25, 512 }
  0x5a   : > { %v845_v8 = vpack.c.bf16 %v226_v6, %v222_v5  ;;  %v230_v11 = vld [vmem:[#allocation5 + $0x98] sm:$0xff]  ;;  %842 = vmatprep.subr.bf16.mxu1 %v841_v3  ;;  %v847_v13 = vpack.c.bf16 %v225_v10, %v221_v9  ;;  %v229_v18 = vld [vmem:[#allocation5 + $0x90] sm:$0xff]  ;;  %v215_v21 = vld [vmem:[#allocation5 + $0x20] sm:$0xff]  ;;  %p1027_p4 = scmp.ne.s32.totalorder %s1334_s25, %s1026_s27  ;;  %s1104_s28 = smov [#allocation7]  }
  0x5b   : > { %v234_v12 = vld [vmem:[#allocation5 + $0xb8] sm:$0xff]  ;;  %844 = vmatpush1.bf16.msra.mxu1 %v843_v7  ;;  %v233_v19 = vld [vmem:[#allocation5 + $0xb0] sm:$0xff]  ;;  %v795_v22 = vpack.c.bf16 %v215_v21, %v211_v16  ;;  %v220_v25 = vld [vmem:[#allocation5 + $0x48] sm:$0xff]  ;;  %794 = vmatprep.subr.bf16.mxu0 %v793_v20  ;;  %s1030_s29 = sshll.u32 %s1104_s28, 4  ;;  %s1031_s29 = int_to_ptr.vmem [resolvable:$false] %s1030_s29 }
  0x5c   : > { %846 = vmatprep.subr.bf16.mxu1 %v845_v8  ;;  %v849_v17 = vpack.c.bf16 %v234_v12, %v230_v11  ;;  %v238_v23 = vld [vmem:[#allocation5 + $0xd8] sm:$0xff]  ;;  %v224_v26 = vld [vmem:[#allocation5 + $0x68] sm:$0xff]  ;;  %v219_v27 = vld [vmem:[#allocation5 + $0x40] sm:$0xff]  ;;  %v851_v29 = vpack.c.bf16 %v233_v19, %v229_v18  ;;  %p1028_p6 = pnand %p1027_p4, %p1218_p12  ;;  %s1032_s23 = scalar_lea.vmem %s1031_s29, 1024 }
  0x5d   : > { %v242_v24 = vld [vmem:[#allocation5 + $0xf8] sm:$0xff]  ;;  %v223_v28 = vld [vmem:[#allocation5 + $0x60] sm:$0xff]  ;;  %796 = vmatpush1.bf16.msra.mxu0 %v795_v22  ;;  %v237_v30 = vld [vmem:[#allocation5 + $0xd0] sm:$0xff]  ;;  %v797_v32 = vpack.c.bf16 %v224_v26, %v220_v25  ;;  %p1033_p10 = scmp.lt.s32.totalorder %s1334_s25, %s1031_s29  ;;  %p1034_p13 = scmp.lt.s32.totalorder %s1032_s23, %s1026_s27 }
  0x5e   : > { %v241_v31 = vld [vmem:[#allocation5 + $0xf0] sm:$0xff]  ;;  %v799_v33 = vpack.c.bf16 %v223_v28, %v219_v27  ;;  %v853_v34 = vpack.c.bf16 %v242_v24, %v238_v23  ;;  %v246_v35 = vld [vmem:[#allocation5 + $0x118] sm:$0xff]  ;;  %v228_v36 = vld [vmem:[#allocation5 + $0x88] sm:$0xff]  ;;  %p1029_p8 = pneg %p1028_p6 }
  0x5f   : > { %848 = vmatpush1.bf16.msra.mxu1 %v847_v13  ;;  %v232_v37 = vld [vmem:[#allocation5 + $0xa8] sm:$0xff]  ;;  %798 = vmatprep.subr.bf16.mxu0 %v797_v32  ;;  %v250_v38 = vld [vmem:[#allocation5 + $0x138] sm:$0xff]  ;;  %v227_v40 = vld [vmem:[#allocation5 + $0x80] sm:$0xff]  ;;  %v855_v42 = vpack.c.bf16 %v241_v31, %v237_v30  ;;  %p1035_p3 = por %p1034_p13, %p1033_p10 }
  0x60   : > { %850 = vmatprep.subr.bf16.mxu1 %v849_v17  ;;  %v801_v39 = vpack.c.bf16 %v232_v37, %v228_v36  ;;  %v231_v41 = vld [vmem:[#allocation5 + $0xa0] sm:$0xff]  ;;  %v245_v43 = vld [vmem:[#allocation5 + $0x110] sm:$0xff]  ;;  %v236_v45 = vld [vmem:[#allocation5 + $0xc8] sm:$0xff]  ;;  %v857_v47 = vpack.c.bf16 %v250_v38, %v246_v35 }
  0x61   : > { %800 = vmatpush1.bf16.msra.mxu0 %v799_v33  ;;  %v803_v44 = vpack.c.bf16 %v231_v41, %v227_v40  ;;  %v240_v46 = vld [vmem:[#allocation5 + $0xe8] sm:$0xff]  ;;  %v249_v48 = vld [vmem:[#allocation5 + $0x130] sm:$0xff]  ;;  %v235_v50 = vld [vmem:[#allocation5 + $0xc0] sm:$0xff]  ;;  %p1036_p7 = pnand %p1035_p3, %p1029_p8 }
  0x62   : > { %802 = vmatprep.subr.bf16.mxu0 %v801_v39  ;;  %v805_v49 = vpack.c.bf16 %v240_v46, %v236_v45  ;;  %v239_v51 = vld [vmem:[#allocation5 + $0xe0] sm:$0xff]  ;;  %v254_v52 = vld [vmem:[#allocation5 + $0x158] sm:$0xff]  ;;  %v244_v54 = vld [vmem:[#allocation5 + $0x108] sm:$0xff]  ;;  %v859_v56 = vpack.c.bf16 %v249_v48, %v245_v43 }
  0x63   : > { %852 = vmatpush1.bf16.msra.mxu1 %v851_v29  ;;  %v258_v53 = vld [vmem:[#allocation5 + $0x178] sm:$0xff]  ;;  %v248_v55 = vld [vmem:[#allocation5 + $0x128] sm:$0xff]  ;;  %v253_v57 = vld [vmem:[#allocation5 + $0x150] sm:$0xff]  ;;  %v807_v59 = vpack.c.bf16 %v239_v51, %v235_v50 }
  0x64   : > { %854 = vmatprep.subr.bf16.mxu1 %v853_v34  ;;  %v257_v58 = vld [vmem:[#allocation5 + $0x170] sm:$0xff]  ;;  %v861_v60 = vpack.c.bf16 %v258_v53, %v254_v52  ;;  %v262_v61 = vld [vmem:[#allocation5 + $0x198] sm:$0xff]  ;;  %v809_v62 = vpack.c.bf16 %v248_v55, %v244_v54  ;;  %v243_v63 = vld [vmem:[#allocation5 + $0x100] sm:$0xff] }
  0x65   : > { %804 = vmatpush1.bf16.msra.mxu0 %v803_v44  ;;  %v247_v0 = vld [vmem:[#allocation5 + $0x120] sm:$0xff]  ;;  %v266_v1 = vld [vmem:[#allocation5 + $0x1b8] sm:$0xff]  ;;  %v252_v2 = vld [vmem:[#allocation5 + $0x148] sm:$0xff]  ;;  %v863_v4 = vpack.c.bf16 %v257_v58, %v253_v57 }
  0x66   : > { %806 = vmatprep.subr.bf16.mxu0 %v805_v49  ;;  %v256_v3 = vld [vmem:[#allocation5 + $0x168] sm:$0xff]  ;;  %v261_v5 = vld [vmem:[#allocation5 + $0x190] sm:$0xff]  ;;  %v811_v7 = vpack.c.bf16 %v247_v0, %v243_v63  ;;  %v865_v8 = vpack.c.bf16 %v266_v1, %v262_v61  ;;  %v270_v9 = vld [vmem:[#allocation5 + $0x1d8] sm:$0xff] }
  0x67   : > { %856 = vmatpush1.bf16.msra.mxu1 %v855_v42  ;;  %v265_v6 = vld [vmem:[#allocation5 + $0x1b0] sm:$0xff]  ;;  %v813_v10 = vpack.c.bf16 %v256_v3, %v252_v2  ;;  %v251_v11 = vld [vmem:[#allocation5 + $0x140] sm:$0xff]  ;;  %v274_v13 = vld [vmem:[#allocation5 + $0x1f8] sm:$0xff] }
  0x68   : > { %858 = vmatprep.subr.bf16.mxu1 %v857_v47  ;;  %v255_v12 = vld [vmem:[#allocation5 + $0x160] sm:$0xff]  ;;  %v260_v14 = vld [vmem:[#allocation5 + $0x188] sm:$0xff]  ;;  %v867_v16 = vpack.c.bf16 %v265_v6, %v261_v5  ;;  %v269_v17 = vld [vmem:[#allocation5 + $0x1d0] sm:$0xff]  ;;  %v869_v20 = vpack.c.bf16 %v274_v13, %v270_v9 }
  0x69   : > { %808 = vmatpush1.bf16.msra.mxu0 %v807_v59  ;;  %v264_v15 = vld [vmem:[#allocation5 + $0x1a8] sm:$0xff]  ;;  %v273_v18 = vld [vmem:[#allocation5 + $0x1f0] sm:$0xff]  ;;  %v815_v19 = vpack.c.bf16 %v255_v12, %v251_v11  ;;  %v278_v21 = vld [vmem:[#allocation5 + $0x218] sm:$0xff] }
  0x6a   : > { %810 = vmatprep.subr.bf16.mxu0 %v809_v62  ;;  %v817_v22 = vpack.c.bf16 %v264_v15, %v260_v14  ;;  %v259_v23 = vld [vmem:[#allocation5 + $0x180] sm:$0xff]  ;;  %v282_v25 = vld [vmem:[#allocation5 + $0x238] sm:$0xff]  ;;  %v268_v26 = vld [vmem:[#allocation5 + $0x1c8] sm:$0xff]  ;;  %v871_v28 = vpack.c.bf16 %v273_v18, %v269_v17 }
  0x6b   : > { %860 = vmatpush1.bf16.msra.mxu1 %v859_v56  ;;  %v263_v24 = vld [vmem:[#allocation5 + $0x1a0] sm:$0xff]  ;;  %v272_v27 = vld [vmem:[#allocation5 + $0x1e8] sm:$0xff]  ;;  %v277_v29 = vld [vmem:[#allocation5 + $0x210] sm:$0xff]  ;;  %v873_v33 = vpack.c.bf16 %v282_v25, %v278_v21 }
  0x6c   : > { %862 = vmatprep.subr.bf16.mxu1 %v861_v60  ;;  %v281_v30 = vld [vmem:[#allocation5 + $0x230] sm:$0xff]  ;;  %v819_v31 = vpack.c.bf16 %v263_v24, %v259_v23  ;;  %v286_v32 = vld [vmem:[#allocation5 + $0x258] sm:$0xff]  ;;  %v821_v35 = vpack.c.bf16 %v272_v27, %v268_v26  ;;  %v267_v36 = vld [vmem:[#allocation5 + $0x1c0] sm:$0xff]  ;;  %v313_v24 = vlaneseq }
  0x6d   : > { %812 = vmatpush1.bf16.msra.mxu0 %v811_v7  ;;  %v290_v34 = vld [vmem:[#allocation5 + $0x278] sm:$0xff]  ;;  %v271_v37 = vld [vmem:[#allocation5 + $0x1e0] sm:$0xff]  ;;  %v276_v38 = vld [vmem:[#allocation5 + $0x208] sm:$0xff]  ;;  %v875_v41 = vpack.c.bf16 %v281_v30, %v277_v29 }
  0x6e   : > { %814 = vmatprep.subr.bf16.mxu0 %v813_v10  ;;  %v280_v39 = vld [vmem:[#allocation5 + $0x228] sm:$0xff]  ;;  %v285_v42 = vld [vmem:[#allocation5 + $0x250] sm:$0xff]  ;;  %v823_v44 = vpack.c.bf16 %v271_v37, %v267_v36  ;;  %v877_v45 = vpack.c.bf16 %v290_v34, %v286_v32  ;;  %v294_v46 = vld [vmem:[#allocation5 + $0x298] sm:$0xff]  ;;  %v1307_v25 = vshrl.u32 %v313_v24, 7 }
  0x6f   : > { %864 = vmatpush1.bf16.msra.mxu1 %v863_v4  ;;  %v1283_v40 = vld [vmem:[%s1272_s9 + $0x8] sm:$0xff]  ;;  %v289_v43 = vld [vmem:[#allocation5 + $0x270] sm:$0xff]  ;;  %v825_v47 = vpack.c.bf16 %v280_v39, %v276_v38  ;;  %v275_v48 = vld [vmem:[#allocation5 + $0x200] sm:$0xff] }
  0x70   : > { %866 = vmatprep.subr.bf16.mxu1 %v865_v8  ;;  %781 = vmatprep.mubr.msk.f32.mxu1 %vm333_vm0, %v1283_v40  ;;  %v279_v49 = vld [vmem:[#allocation5 + $0x220] sm:$0xff]  ;;  %v298_v50 = vld [vmem:[#allocation5 + $0x2b8] sm:$0xff]  ;;  %v284_v51 = vld [vmem:[#allocation5 + $0x248] sm:$0xff]  ;;  %v879_v53 = vpack.c.bf16 %v289_v43, %v285_v42  ;;  %v323_v26 = vsub.s32 2, %v1307_v25  ;;  %v319_v29 = vsub.s32 1, %v1307_v25 }
  0x71   : > { %816 = vmatpush1.bf16.msra.mxu0 %v815_v19  ;;  %779 = vmatprep.mubr.msk.f32.mxu0 %vm333_vm0, %v1283_v40  ;;  %v288_v52 = vld [vmem:[#allocation5 + $0x268] sm:$0xff]  ;;  %v293_v54 = vld [vmem:[#allocation5 + $0x290] sm:$0xff]  ;;  %v827_v56 = vpack.c.bf16 %v279_v49, %v275_v48  ;;  %v881_v57 = vpack.c.bf16 %v298_v50, %v294_v46  ;;  %v302_v58 = vld [vmem:[#allocation5 + $0x2d8] sm:$0xff] }
  0x72   : > { %818 = vmatprep.subr.bf16.mxu0 %v817_v22  ;;  %v297_v55 = vld [vmem:[#allocation5 + $0x2b0] sm:$0xff]  ;;  %v829_v59 = vpack.c.bf16 %v288_v52, %v284_v51  ;;  %v283_v60 = vld [vmem:[#allocation5 + $0x240] sm:$0xff]  ;;  %v306_v62 = vld [vmem:[#allocation5 + $0x2f8] sm:$0xff] }
  0x73   : > { %868 = vmatpush1.bf16.msra.mxu1 %v867_v16  ;;  %v287_v61 = vld [vmem:[#allocation5 + $0x260] sm:$0xff]  ;;  %v292_v63 = vld [vmem:[#allocation5 + $0x288] sm:$0xff]  ;;  %v883_v1 = vpack.c.bf16 %v297_v55, %v293_v54  ;;  %v301_v2 = vld [vmem:[#allocation5 + $0x2d0] sm:$0xff]  ;;  %v885_v4 = vpack.c.bf16 %v306_v62, %v302_v58 }
  0x74   : > { %870 = vmatprep.subr.bf16.mxu1 %v869_v20  ;;  %v296_v0 = vld [vmem:[#allocation5 + $0x2a8] sm:$0xff]  ;;  %v831_v3 = vpack.c.bf16 %v287_v61, %v283_v60  ;;  %v305_v5 = vld [vmem:[#allocation5 + $0x2f0] sm:$0xff]  ;;  %v291_v7 = vld [vmem:[#allocation5 + $0x280] sm:$0xff]  ;;  %v592_v60 = vsel %vm333_vm0, %v1283_v40, 0.0 }
  0x75   : > { %820 = vmatpush1.bf16.msra.mxu0 %v819_v31  ;;  %v833_v6 = vpack.c.bf16 %v296_v0, %v292_v63  ;;  %v295_v8 = vld [vmem:[#allocation5 + $0x2a0] sm:$0xff]  ;;  %v300_v9 = vld [vmem:[#allocation5 + $0x2c8] sm:$0xff]  ;;  %v887_v11 = vpack.c.bf16 %v305_v5, %v301_v2  ;;  %v310_v16 = vld [vmem:[#allocation5 + $0x318] sm:$0xff] }
  0x76   : > { %822 = vmatprep.subr.bf16.mxu0 %v821_v35  ;;  %v304_v10 = vld [vmem:[#allocation5 + $0x2e8] sm:$0xff]  ;;  %v835_v12 = vpack.c.bf16 %v295_v8, %v291_v7  ;;  %v299_v14 = vld [vmem:[#allocation5 + $0x2c0] sm:$0xff]  ;;  %v309_v18 = vld [vmem:[#allocation5 + $0x310] sm:$0xff] }
  0x77   : > { %872 = vmatpush1.bf16.msra.mxu1 %v871_v28  ;;  %v837_v13 = vpack.c.bf16 %v304_v10, %v300_v9  ;;  %v303_v15 = vld [vmem:[#allocation5 + $0x2e0] sm:$0xff]  ;;  %v308_v20 = vld [vmem:[#allocation5 + $0x308] sm:$0xff]  ;;  %v1293_v21 = vld [vmem:[%s1272_s9 + $0x18] sm:$0xff]  ;;  %v327_v28 = vsub.s32 3, %v1307_v25  ;;  %v606_v10 = vand.u32 127, %v313_v24 }
  0x78   : > { %874 = vmatprep.subr.bf16.mxu1 %v873_v33  ;;  %v839_v17 = vpack.c.bf16 %v303_v15, %v299_v14  ;;  %v1290_v19 = vld [vmem:[%s1272_s9] sm:$0xff]  ;;  %v1299_v23 = vld [vmem:[%s1272_s9 + $0x10] sm:$0xff] }
  0x79   : > { %824 = vmatpush1.bf16.msra.mxu0 %v823_v44  ;;  %v307_v22 = vld [vmem:[#allocation5 + $0x300] sm:$0xff]  ;;  %v593_v61 = vadd.f32 %v592_v60, %v1290_v19  ;;  %v609_v15 = vsub.s32 %v606_v10, %v1307_v25 }
  0x7a   : > { %826 = vmatprep.subr.bf16.mxu0 %v825_v47  ;;  %v311_v27 = vld [vmem:[%s1391_s2] sm:$0xf]  ;;  %v315_v47 = vsub.s32 0, %v1307_v25 }
  0x7b   : > { %876 = vmatpush1.bf16.msra.mxu1 %v875_v41  ;;  %v324_v31 = vrot.slane %v311_v27, %v323_v26  ;;  %v328_v33 = vrot.slane %v311_v27, %v327_v28  ;;  %v320_v34 = vrot.slane %v311_v27, %v319_v29 }
  0x7c   : > { %878 = vmatprep.subr.bf16.mxu1 %v877_v45  ;;  %v316_v51 = vrot.slane %v311_v27, %v315_v47 }
  0x7d   : > { %828 = vmatpush1.bf16.msra.mxu0 %v827_v56 }
  0x7e   : > { %830 = vmatprep.subr.bf16.mxu0 %v829_v59 }
  0x7f   : > { %880 = vmatpush1.bf16.msra.mxu1 %v879_v53 }
  0x80   : > { %882 = vmatprep.subr.bf16.mxu1 %v881_v57 }
  0x81   : > { %832 = vmatpush1.bf16.msra.mxu0 %v831_v3 }
  0x82   : > { %834 = vmatprep.subr.bf16.mxu0 %v833_v6  ;;  %v596_v6 = vsel %vm333_vm0, %v1293_v21, 0.0 }
  0x83   : > { %884 = vmatpush1.bf16.msra.mxu1 %v883_v1  ;;  %v597_v9 = vadd.f32 %v596_v6, %v1299_v23 }
  0x84   : > { %886 = vmatprep.subr.bf16.mxu1 %v885_v4 }
  0x85   : > { %836 = vmatpush1.bf16.msra.mxu0 %v835_v12 }
  0x86   : > { %838 = vmatprep.subr.bf16.mxu0 %v837_v13  ;;  %v611_v13 = vadd.s32 4294967288, %v606_v10 }
  0x87   : > { %888 = vmatpush1.bf16.msra.mxu1 %v887_v11 }
  0x88   : > { %465 = vmatprep.subr.mxu1 %v310_v16 }
  0x89   : > { %840 = vmatpush1.bf16.msra.mxu0 %v839_v17  ;;  %v614_v17 = vsub.s32 %v611_v13, %v1307_v25 }
  0x8a   : > { %388 = vmatprep.subr.mxu0 %v308_v20 }
  0x8b   : > { %466 = vmatpush1.msra.mxu1 %v309_v18 }
  0x8c   : > { %482 = vmatmul.mubr.f32.vlgmr.msra.gmra.mrb[0].mxu1 %v1290_v19 }
  0x8d   : > { %782 = vmatprep.mubr.msk.f32.mxu1 %vm333_vm0, %v1293_v21  ;;  %389 = vmatpush1.msra.mxu0 %v307_v22 }
  0x8e   : > { %405 = vmatmul.mubr.f32.vlgmr.msra.gmra.mrb[0].mxu0 %v1290_v19 }
  0x8f   : > { %780 = vmatprep.mubr.msk.f32.mxu0 %vm333_vm0, %v1293_v21 }
  0x90   : > { %488 = vmatmul.mubr.f32.gmra.mrb[2].mxu1 %v1299_v23 }
  0x92   : > { %411 = vmatmul.mubr.f32.gmra.mrb[2].mxu0 %v1299_v23 }
 0x15f   : > { %v483_v30 = vpop.f32.mrb[0].mxu1 }
 0x160   : > { %v485_v32 = vpop.f32.mrb[1].mxu1  ;;  %v484_v37 = vadd.f32 %v483_v30, %v324_v31 }
 0x161   : > { %v406_v36 = vpop.f32.mrb[0].mxu0  ;;  %v486_v42 = vadd.f32 %v485_v32, %v328_v33 }
 0x162   : > { %v408_v41 = vpop.f32.mrb[1].mxu0  ;;  %v407_v53 = vadd.f32 %v406_v36, %v316_v51 }
 0x163   : > { %v489_v35 = vpop.f32.mrb[2].mxu1  ;;  %v409_v44 = vadd.f32 %v408_v41, %v320_v34 }
 0x164   : > { %v490_v38 = vadd.f32 %v489_v35, %v324_v31  ;;  %v491_v39 = vpop.f32.mrb[3].mxu1 }
 0x165   : > { %v492_v43 = vadd.f32 %v491_v39, %v328_v33  ;;  %v412_v48 = vpop.f32.mrb[2].mxu0  ;;  %558 = vmatprep.mubr.f32.mxu0 %v409_v44 }
 0x166   : > { %v891_v45 = vpack.c.bf16 %v490_v38, %v484_v37  ;;  %v414_v49 = vpop.f32.mrb[3].mxu0  ;;  %v413_v52 = vadd.f32 %v412_v48, %v316_v51 }
 0x167   : > { %v889_v46 = vpack.c.bf16 %v492_v43, %v486_v42  ;;  %v415_v50 = vadd.f32 %v414_v49, %v320_v34 }
 0x169   : > { %890 = vmatprep.subr.bf16.mxu0 %v889_v46  ;;  %893 = vmatprep.subr.bf16.mxu1 %v889_v46 }
 0x16a   : > { %892 = vmatpush1.bf16.xpose.msra.mxu0 %v891_v45  ;;  %894 = vmatpush1.bf16.xpose.msra.mxu1 %v891_v45 }
 0x16b   : > { %563 = vmatprep.mubr.f32.mxu1 %v415_v50 }
 0x171   : > { %559 = vmatmul.mubr.f32.vlgmr.msra.gmra.mrb[4].mxu0 %v407_v53  ;;  %564 = vmatmul.mubr.f32.vlgmr.msra.gmra.mrb[4].mxu1 %v413_v52 }
 0x244   : > { %v560_v54 = vpop.f32.mrb[4].mxu0  ;;  %v565_v55 = vpop.f32.mrb[4].mxu1 }
 0x245   : > { %v562_v56 = vpop.f32.mrb[5].mxu0  ;;  %v570_v57 = vsel %vm569_vm1, %v560_v54, -inf  ;;  %v567_v58 = vpop.f32.mrb[5].mxu1  ;;  %v573_v59 = vsel %vm569_vm1, %v565_v55, -inf }
 0x246   : > { %571 = vmax.xlane.f32.xlu0 %v570_v57 }
 0x24a   : > { %574 = vmax.xlane.f32.xlu0 %v573_v59 }
 0x24e   : > { %594 = vadd.xlane.f32.xlu0 %v593_v61 }
 0x2d3   : > { %v572_v62 = vpop.xlane.xlu0 %571 }
 0x2d4   : > { %v576_v63 = vsub.f32 %v560_v54, %v572_v62 }
 0x2d6   : > { %v578_v0 = vmul.f32 1.442695, %v576_v63 }
 0x2d7   : > { %v575_v1 = vpop.xlane.xlu0 %574 }
 0x2d8   : > { %958 = vpow2.f32 %v578_v0  ;;  %v577_v2 = vsub.f32 %v565_v55, %v575_v1 }
 0x2da   : > { %v580_v3 = vmul.f32 1.442695, %v577_v2 }
 0x2db   : > { %v595_v12 = vpop.xlane.xlu0 %594 }
 0x2dc   : > { %960 = vpow2.f32 %v580_v3  ;;  %v601_v16 = vmul.f32 0.005, %v595_v12 }
 0x2de   : > { %v610_v22 = vrot.slane %v601_v16, %v609_v15 }
 0x2e2   : > { %v959_v4 = vpop.eup %958 }
 0x2e3   : > { %v582_v5 = vsel %vm569_vm1, %v959_v4, 0.0 }
 0x2e4   : > { %583 = vadd.xlane.f32.xlu1 %v582_v5 }
 0x2e6   : > { %v961_v7 = vpop.eup %960 }
 0x2e7   : > { %v585_v8 = vsel %vm569_vm1, %v961_v7, 0.0 }
 0x2e8   : > { %586 = vadd.xlane.f32.xlu1 %v585_v8 }
 0x2ec   : > { %598 = vadd.xlane.f32.xlu1 %v597_v9 }
 0x371   : > { %v584_v11 = vpop.xlane.xlu1 %583 }
 0x372   : > { %962 = vrcp.f32 %v584_v11 }
 0x375   : > { %v587_v14 = vpop.xlane.xlu1 %586 }
 0x376   : > { %964 = vrcp.f32 %v587_v14 }
 0x379   : > { %v599_v18 = vpop.xlane.xlu1 %598 }
 0x37a   : > { %v602_v20 = vmul.f32 0.005, %v599_v18 }
 0x37c   : > { %v963_v26 = vpop.eup %962  ;;  %v615_v27 = vrot.slane %v602_v20, %v614_v17 }
 0x37d   : > { %v589_v28 = vmul.f32 %v963_v26, %v959_v4 }
 0x37e   : > { %v617_v29 = vsel %vm616_vm2, %v615_v27, %v610_v22 }
 0x37f   : > { %v631_v24 = vmul.f32 %v617_v29, %v589_v28 }
 0x380   : > { %v965_v30 = vpop.eup %964 }
 0x381   : > { %v633_v31 = vsel %vm569_vm1, %v631_v24, 0.0  ;;  %v591_v32 = vmul.f32 %v965_v30, %v961_v7 }
 0x382   : > { %634 = vadd.xlane.f32.xlu0 %v633_v31 }
 0x383   : > { %v632_v33 = vmul.f32 %v617_v29, %v591_v32 }
 0x385   : > { %v636_v34 = vsel %vm569_vm1, %v632_v33, 0.0 }
 0x386   : > { %637 = vadd.xlane.f32.xlu1 %v636_v34 }
 0x40f   : > { %v635_v35 = vpop.xlane.xlu0 %634 }
 0x413   : > { %v638_v25 = vpop.xlane.xlu1 %637 }
 0x414   : > { %v639_v36 = vmin.f32 %v635_v35, %v638_v25  ;;  %v646_v37 = vmax.f32 %v635_v35, %v638_v25 }
 0x416   : > { %v640_v38 = vrot.slane %v639_v36, 4  ;;  %v647_v39 = vrot.slane %v646_v37, 4 }
 0x418   : > { %v641_v41 = vmin.f32 %v639_v36, %v640_v38  ;;  %v648_v42 = vmax.f32 %v646_v37, %v647_v39 }
 0x41a   : > { %v642_v43 = vrot.slane %v641_v41, 2  ;;  %v649_v44 = vrot.slane %v648_v42, 2 }
 0x41c   : > { %v643_v45 = vmin.f32 %v641_v41, %v642_v43  ;;  %v650_v46 = vmax.f32 %v648_v42, %v649_v44 }
 0x41e   : > { %v644_v47 = vrot.slane %v643_v45, 1  ;;  %v651_v48 = vrot.slane %v650_v46, 1 }
 0x420   : > { %v645_v49 = vmin.f32 %v643_v45, %v644_v47  ;;  %v652_v50 = vmax.f32 %v650_v46, %v651_v48 }
 0x422   : > { %v655_v51 = vsub.f32 %v652_v50, %v645_v49  ;;  %v653_v52 = vsub.f32 %v635_v35, %v645_v49  ;;  %v654_v53 = vsub.f32 %v638_v25, %v645_v49 }
 0x424   : > { %966 = vrcp.f32 %v655_v51 }
 0x42e   : > { %v967_v54 = vpop.eup %966 }
 0x42f   : > { %v657_v55 = vmul.f32 %v967_v54, %v653_v52  ;;  %v658_v56 = vmul.f32 %v967_v54, %v654_v53 }
 0x431   : > { %v659_v57 = vadd.f32 1e-06, %v657_v55  ;;  %v660_v58 = vadd.f32 1e-06, %v658_v56 }
 0x433   : > { %v661_v59 = vmul.f32 %v659_v57, %v1290_v19  ;;  %v662_v60 = vmul.f32 %v659_v57, %v1283_v40  ;;  %v663_v61 = vmul.f32 %v660_v58, %v1299_v23  ;;  %v664_v62 = vmul.f32 %v660_v58, %v1293_v21 }
 0x435   : > { %665 = vst [vmem:[%s204_s4] sm:$0xff] %v661_v59  ;;  %666 = vst.msk [vmem:[%s204_s4 + $0x8] sm:$0xff] %vm333_vm0, %v662_v60 }
 0x436   : > { %667 = vst [vmem:[%s204_s4 + $0x10] sm:$0xff] %v663_v61  ;;  %668 = vst.msk [vmem:[%s204_s4 + $0x18] sm:$0xff] %vm333_vm0, %v664_v62 }
 0x437   : > { %1039 = shalt.err (!%p1036_p7)
}
 0x438   : > { %s1040_s30 = scalar_lea.hbm %s1339_s11, 512  ;;  %s1044_s8 = scalar_lea.hbm %s1392_s3, 1024 }
 0x439   : > { %p1041_p9 = scmp.ne.s32.totalorder %s1339_s11, %s1040_s30  ;;  %p1045_p5 = scmp.lt.u32.totalorder %s1339_s11, %s1392_s3 }
 0x43a   : > { %p1046_p11 = scmp.lt.u32.totalorder %s1044_s8, %s1040_s30  ;;  %p1048_p4 = scmp.lt.u32.totalorder %s1040_s30, %s1339_s11 }
 0x43b   : > { %p1042_p2 = pnand %p1041_p9, %p1218_p12 }
 0x43c   : > { %p1047_p1 = por %p1046_p11, %p1045_p5 }
 0x43d   : > { %p1043_p0 = pneg %p1042_p2 }
 0x43e   : > { %p1049_p6 = por %p1048_p4, %p1047_p1 }
 0x440   : > { %p1050_p8 = pnand %p1049_p6, %p1043_p0 }
 0x442   : > { %1053 = shalt.err (!%p1050_p8)
}
 0x443   : > { %s1105_s20 = smov 256   ;;  %s1106_s4 = smov 16  }
 0x444   : > { %901 = dma.vmem_to_hbm [thread:$0]  (%p1218_p12), %s1334_s25, 512, %s1339_s11, %s670_s16, %s1105_s20, %s1105_s20, %s1106_s4  }
 0x445 PF: > { %s699_s26 = sand.u32 1, %s1084_s12   ;;  %p1407_p10 = scmp.ne.s32.totalorder %s1397_s19, 0 }
 0x446   : > { %p1408_p13 = scmp.ge.s32.totalorder %s1096_s15, 2  ;;  %s700_s5 = scalar_lea.sflag [#allocation4], %s699_s26 }
 0x448   : > { %p912_p3 = pnand %p1408_p13, %p1407_p10 }
 0x44a   : > { %1079 = dma.done.wait (!%p912_p3), %s700_s5, 512  }
 0x44b   : > { %1081 = vsyncadd (!%p912_p3), %s700_s5, 4294966784  ;;  %p17_p7 = scmp.ge.s32.totalorder %s1183_s24, 4   ;;  %s1409_s12 = smov %s1088_s13 }
 0x44c   : > { %s1410_s13 = smov %s1092_s14  ;;  %s1411_s14 = smov %s1214_s17 }
 0x44d   : > { %s1412_s15 = smov %s1183_s24  ;;  %19 = sbr.rel (!%p17_p7) target bundleno = 6 (0x6), region = 81 }
 0x454   :  { %705 = vsyncpa [#allocation3], 1 }
 0x455   :  { %707 = vsyncpa [#allocation3 + $0x1], 1 }
 0x456   :  { %708 = vsyncpa [#allocation6], 1 }
 0x457   :  { %709 = vsyncpa [#allocation4], 1 }
 0x458   :  { %711 = vsyncpa [#allocation4 + $0x1], 1 }

// kernel: tpu_custom_call.1
= control target key start
LH: loop header
LB: loop body
LE: loop exit
PB: predicated region body
PF: predicated region fallthrough
CT: control target
= control target key end

     0   :  { %8 = vsyncpa [#allocation3], 0  ;;  %s1389_s0 = inlined_call_operand.hbm [shape: f32[32,200], index: 0, kind: input, shape index: {}]   ;;  %s1390_s1 = inlined_call_operand.hbm [shape: f32[200,512], index: 1, kind: input, shape index: {}]   ;;  %s1391_s2 = inlined_call_operand.vmem [shape: f32[1,512], index: 2, kind: input, shape index: {}]   ;;  %s1392_s3 = inlined_call_operand.hbm [shape: f32[32,200], index: 3, kind: output, shape index: {}]  }
   0x1   :  { %10 = vsyncpa [#allocation3 + $0x1], 0 }
   0x2   :  { %11 = vsyncpa [#allocation6], 0 }
   0x3   :  { %12 = vsyncpa [#allocation4], 0 }
   0x4   :  { %14 = vsyncpa [#allocation4 + $0x1], 0  ;;  %s1127_s12 = smov 0   ;;  %s1129_s13 = smov 0  }
   0x5   :  { %s1131_s14 = smov 0   ;;  %s1133_s15 = smov 0  }
   0x6 LB: > { %s1148_s16 = sadd.s32 4294967295, %s1096_s15   ;;  %s767_s17 = sadd.s32 4294967294, %s1096_s15   ;;  %s1096_s15 = sphi %s1133_s15, %s1412_s15   ;;  %s1092_s14 = sphi %s1131_s14, %s1411_s14   ;;  %s1088_s13 = sphi %s1129_s13, %s1410_s13   ;;  %s1084_s12 = sphi %s1127_s12, %s1409_s12  }
   0x7   : > { %p40_p0 = scmp.ne.s32.totalorder %s1088_s13, %s1084_s12  ;;  %p1393_p1 = scmp.eq.s32.totalorder %s1148_s16, 0 }
   0x8   : > { %p112_p3 = scmp.eq.s32.totalorder %s767_s17, 1  ;;  %p768_p5 = scmp.ge.s32.totalorder %s1096_s15, 1 }
   0x9   : > { %p1157_p4 = por %p1393_p1, %p40_p0  ;;  %p119_p7 = scmp.lt.s32.totalorder %s1096_s15, 3 }
   0xa   : > { %p1162_p6 = por %p112_p3, %p40_p0  ;;  %s1098_s21 = smov [#allocation5]  }
   0xb   : > { %s1396_s18 = scalar_select %p1157_p4, 1, 0 }
   0xc   : > { %s1397_s19 = scalar_select %p1162_p6, 1, 0 }
   0xd   : > { %p1167_p8 = pnand %p768_p5, %p119_p7  ;;  %s131_s22 = sshll.u32 %s1098_s21, 4  ;;  %s1171_s22 = int_to_ptr.vmem [resolvable:$true] %s131_s22 }
   0xe   : > { %s1183_s24 = sadd.s32 1, %s1096_s15   ;;  %s27_s25 = sadd.s32 1, %s1092_s14 }
   0xf   : > { %s1398_s20 = scalar_select %p1167_p8, 1, 0 }
  0x10   : > { %p903_p9 = pneg %p1167_p8  ;;  %s24_s26 = ssub.s32 %s1096_s15, %s1183_s24 }
  0x11   : > { %s968_s29 = scalar_lea.hbm %s1390_s1, 12800 }
  0x12   : > { %p1178_p11 = pnand %p903_p9, %p1393_p1  ;;  %p969_p12 = scmp.ne.s32.totalorder %s1390_s1, %s968_s29 }
  0x13   : > { %p975_p5 = scmp.lt.u32.totalorder %s968_s29, %s1390_s1 }
  0x14   : > { %p970_p13 = pneg %p1178_p11 }
  0x16   : > { %p971_p0 = pnand %p970_p13, %p969_p12 }
  0x18   : > { %p972_p3 = pneg %p971_p0 }
  0x1a   : > { %p977_p7 = pnand %p975_p5, %p972_p3 }
  0x1c   : > { %980 = shalt.err (!%p977_p7)
}
  0x1d   : > { %s981_s7 = scalar_lea.vmem %s1171_s22, 12800  ;;  %p989_p2 = scmp.lt.s32.totalorder %s1171_s22, %s1171_s22 }
  0x1e   : > { %p982_p9 = scmp.ne.s32.totalorder %s1171_s22, %s981_s7  ;;  %p990_p6 = scmp.lt.s32.totalorder %s981_s7, %s981_s7 }
  0x20   : > { %p984_p10 = pnand %p982_p9, %p970_p13  ;;  %p991_p4 = por %p990_p6, %p989_p2 }
  0x22   : > { %p985_p1 = pneg %p984_p10 }
  0x24   : > { %p992_p8 = pnand %p991_p4, %p985_p1 }
  0x26   : > { %995 = shalt.err (!%p992_p8)
}
  0x27   : > { %s1099_s8 = smov 512   ;;  %s1100_s9 = smov 32  }
  0x28   : > { %906 = dma.hbm_to_vmem [thread:$0]  (!%p1178_p11), %s1390_s1, 12800, %s1171_s22, [#allocation6], %s1099_s8, %s1099_s8, %s1100_s9  }
  0x29   : > { %p25_p2 = scmp.eq.s32.totalorder %s24_s26, 0  ;;  %p34_p1 = scmp.ne.s32.totalorder %s1092_s14, %s1088_s13 }
  0x2a   : > { %p35_p4 = scmp.eq.s32.totalorder %s1096_s15, 0  ;;  %p916_p6 = scmp.lt.s32.totalorder %s1096_s15, 2 }
  0x2b   : > { %s1214_s17 = scalar_select %p25_p2, %s1092_s14, %s27_s25  }
  0x2c   : > { %p36_p8 = por %p35_p4, %p34_p1  ;;  %p1400_p10 = scmp.eq.s32.totalorder %s1148_s16, 1 }
  0x2d   : > { %s148_s27 = sand.u32 1, %s1092_s14   ;;  %s790_s28 = sshll.u32 %s1096_s15, 9 }
  0x2e   : > { %p1218_p12 = por %p1400_p10, %p34_p1  ;;  %s771_s29 = sshll.u32 %s148_s27, 5 }
  0x2f   : > { %s1227_s4 = scalar_lea.hbm %s1389_s0, %s790_s28  ;;  %s152_s22 = scalar_lea.vmem [#allocation2], %s771_s29 }
  0x30   : > { %s160_s25 = sshll.u32 %s152_s22, 4  ;;  %p1229_p11 = pnand %p916_p6, %p36_p8  ;;  %s1233_s25 = int_to_ptr.vmem [resolvable:$true] %s160_s25 }
  0x31   : > { %s1235_s5 = scalar_lea.sflag [#allocation3], %s148_s27  ;;  %s996_s6 = scalar_lea.hbm %s1227_s4, 512 }
  0x32   : > { %p997_p13 = scmp.ne.s32.totalorder %s1227_s4, %s996_s6  ;;  %p998_p0 = pneg %p1229_p11 }
  0x33   : > { %s1001_s9 = scalar_lea.hbm %s1389_s0, 1024  ;;  %p1002_p7 = scmp.lt.u32.totalorder %s1227_s4, %s1389_s0 }
  0x34   : > { %p999_p3 = pnand %p998_p0, %p997_p13  ;;  %p1003_p9 = scmp.lt.u32.totalorder %s1001_s9, %s996_s6 }
  0x35   : > { %p1005_p1 = scmp.lt.u32.totalorder %s996_s6, %s1227_s4 }
  0x36   : > { %p1000_p5 = pneg %p999_p3  ;;  %p1004_p2 = por %p1003_p9, %p1002_p7 }
  0x38   : > { %p1006_p4 = por %p1005_p1, %p1004_p2 }
  0x3a   : > { %p1007_p6 = pnand %p1006_p4, %p1000_p5 }
  0x3c   : > { %1010 = shalt.err (!%p1007_p6)
}
  0x3d   : > { %s1011_s27 = scalar_lea.vmem %s1233_s25, 512  ;;  %s1101_s28 = smov [#allocation2]  }
  0x3e   : > { %p1012_p8 = scmp.ne.s32.totalorder %s1233_s25, %s1011_s27  ;;  %s1016_s29 = sshll.u32 %s1101_s28, 4  ;;  %s1017_s29 = int_to_ptr.vmem [resolvable:$false] %s1016_s29 }
  0x3f   : > { %s1018_s23 = scalar_lea.vmem %s1017_s29, 1024  ;;  %p1019_p3 = scmp.lt.s32.totalorder %s1233_s25, %s1017_s29 }
  0x40   : > { %p1014_p10 = pnand %p1012_p8, %p998_p0  ;;  %p1020_p7 = scmp.lt.s32.totalorder %s1018_s23, %s1011_s27 }
  0x42   : > { %p1015_p13 = pneg %p1014_p10  ;;  %p1021_p9 = por %p1020_p7, %p1019_p3 }
  0x44   : > { %p1022_p2 = pnand %p1021_p9, %p1015_p13 }
  0x46   : > { %1025 = shalt.err (!%p1022_p2)
}
  0x47   : > { %s1102_s30 = smov 256   ;;  %s1103_s22 = smov 16  }
  0x48   : > { %910 = dma.hbm_to_vmem [thread:$0]  (!%p1229_p11), %s1227_s4, 512, %s1233_s25, %s1235_s5, %s1102_s30, %s1102_s30, %s1103_s22  }
  0x49   : > { %p1403_p0 = scmp.ne.s32.totalorder %s1398_s20, 0 }
  0x4a   : > { %s1266_s6 = sand.u32 (!%p1403_p0), 1, %s1088_s13   ;;  %p1404_p5 = scmp.ne.s32.totalorder (!%p1403_p0), %s1396_s18, 0 }
  0x4b   : > { %172 = sbr.rel (%p1403_p0) target bundleno = 1093 (0x445), region = 32  ;;  %s776_s7 = sshll.u32 (!%p1403_p0), %s1266_s6, 5 }
  0x4c   : > { %s175_s8 = scalar_lea.sflag (!%p1403_p0), [#allocation3], %s1266_s6  ;;  %s1272_s9 = scalar_lea.vmem (!%p1403_p0), [#allocation2], %s776_s7 }
  0x52   : > { %1071 = dma.done.wait (%p1404_p5), %s175_s8, 512  }
  0x53   : > { %1073 = vsyncadd (%p1404_p5), %s175_s8, 4294966784  ;;  %p1405_p11 = scmp.eq.s32.totalorder %s1148_s16, 0 }
  0x55   : > { %1075 = dma.done.wait (%p1405_p11), [#allocation6], 12800   ;;  %p1406_p1 = pmov %p1405_p11 }
  0x56   : > { %v214_v0 = vld [vmem:[#allocation5 + $0x18] sm:$0xff]  ;;  %v213_v2 = vld [vmem:[#allocation5 + $0x10] sm:$0xff]  ;;  %v212_v14 = vld [vmem:[#allocation5 + $0x8] sm:$0xff]  ;;  %vm333_vm0 = vcmask 588800   ;;  %vm569_vm1 = vcmask 130048   ;;  %vm616_vm2 = vcmask 130112  }
  0x57   : > { %1077 = vsyncadd (%p1406_p1), [#allocation6], 4294954496  ;;  %v218_v1 = vld [vmem:[#allocation5 + $0x38] sm:$0xff]  ;;  %v217_v4 = vld [vmem:[#allocation5 + $0x30] sm:$0xff]  ;;  %s204_s4 = scalar_lea.vmem [#allocation7], %s776_s7  ;;  %s792_s26 = sshll.u32 %s1148_s16, 9 }
  0x58   : > { %v841_v3 = vpack.c.bf16 %v218_v1, %v214_v0  ;;  %v222_v5 = vld [vmem:[#allocation5 + $0x58] sm:$0xff]  ;;  %v843_v7 = vpack.c.bf16 %v217_v4, %v213_v2  ;;  %v221_v9 = vld [vmem:[#allocation5 + $0x50] sm:$0xff]  ;;  %v216_v15 = vld [vmem:[#allocation5 + $0x28] sm:$0xff]  ;;  %s684_s25 = sshll.u32 %s204_s4, 4  ;;  %s1339_s11 = scalar_lea.hbm %s1392_s3, %s792_s26  ;;  %s1334_s25 = int_to_ptr.vmem [resolvable:$true] %s684_s25 }
  0x59   : > { %v226_v6 = vld [vmem:[#allocation5 + $0x78] sm:$0xff]  ;;  %v225_v10 = vld [vmem:[#allocation5 + $0x70] sm:$0xff]  ;;  %v211_v16 = vld [vmem:[#allocation5] sm:$0xff]  ;;  %v793_v20 = vpack.c.bf16 %v216_v15, %v212_v14  ;;  %s670_s16 = scalar_lea.sflag [#allocation4], %s1266_s6  ;;  %s1026_s27 = scalar_lea.vmem %s1334_s25, 512 }
  0x5a   : > { %v845_v8 = vpack.c.bf16 %v226_v6, %v222_v5  ;;  %v230_v11 = vld [vmem:[#allocation5 + $0x98] sm:$0xff]  ;;  %842 = vmatprep.subr.bf16.mxu1 %v841_v3  ;;  %v847_v13 = vpack.c.bf16 %v225_v10, %v221_v9  ;;  %v229_v18 = vld [vmem:[#allocation5 + $0x90] sm:$0xff]  ;;  %v215_v21 = vld [vmem:[#allocation5 + $0x20] sm:$0xff]  ;;  %p1027_p4 = scmp.ne.s32.totalorder %s1334_s25, %s1026_s27  ;;  %s1104_s28 = smov [#allocation7]  }
  0x5b   : > { %v234_v12 = vld [vmem:[#allocation5 + $0xb8] sm:$0xff]  ;;  %844 = vmatpush1.bf16.msra.mxu1 %v843_v7  ;;  %v233_v19 = vld [vmem:[#allocation5 + $0xb0] sm:$0xff]  ;;  %v795_v22 = vpack.c.bf16 %v215_v21, %v211_v16  ;;  %v220_v25 = vld [vmem:[#allocation5 + $0x48] sm:$0xff]  ;;  %794 = vmatprep.subr.bf16.mxu0 %v793_v20  ;;  %s1030_s29 = sshll.u32 %s1104_s28, 4  ;;  %s1031_s29 = int_to_ptr.vmem [resolvable:$false] %s1030_s29 }
  0x5c   : > { %846 = vmatprep.subr.bf16.mxu1 %v845_v8  ;;  %v849_v17 = vpack.c.bf16 %v234_v12, %v230_v11  ;;  %v238_v23 = vld [vmem:[#allocation5 + $0xd8] sm:$0xff]  ;;  %v224_v26 = vld [vmem:[#allocation5 + $0x68] sm:$0xff]  ;;  %v219_v27 = vld [vmem:[#allocation5 + $0x40] sm:$0xff]  ;;  %v851_v29 = vpack.c.bf16 %v233_v19, %v229_v18  ;;  %p1028_p6 = pnand %p1027_p4, %p1218_p12  ;;  %s1032_s23 = scalar_lea.vmem %s1031_s29, 1024 }
  0x5d   : > { %v242_v24 = vld [vmem:[#allocation5 + $0xf8] sm:$0xff]  ;;  %v223_v28 = vld [vmem:[#allocation5 + $0x60] sm:$0xff]  ;;  %796 = vmatpush1.bf16.msra.mxu0 %v795_v22  ;;  %v237_v30 = vld [vmem:[#allocation5 + $0xd0] sm:$0xff]  ;;  %v797_v32 = vpack.c.bf16 %v224_v26, %v220_v25  ;;  %p1033_p10 = scmp.lt.s32.totalorder %s1334_s25, %s1031_s29  ;;  %p1034_p13 = scmp.lt.s32.totalorder %s1032_s23, %s1026_s27 }
  0x5e   : > { %v241_v31 = vld [vmem:[#allocation5 + $0xf0] sm:$0xff]  ;;  %v799_v33 = vpack.c.bf16 %v223_v28, %v219_v27  ;;  %v853_v34 = vpack.c.bf16 %v242_v24, %v238_v23  ;;  %v246_v35 = vld [vmem:[#allocation5 + $0x118] sm:$0xff]  ;;  %v228_v36 = vld [vmem:[#allocation5 + $0x88] sm:$0xff]  ;;  %p1029_p8 = pneg %p1028_p6 }
  0x5f   : > { %848 = vmatpush1.bf16.msra.mxu1 %v847_v13  ;;  %v232_v37 = vld [vmem:[#allocation5 + $0xa8] sm:$0xff]  ;;  %798 = vmatprep.subr.bf16.mxu0 %v797_v32  ;;  %v250_v38 = vld [vmem:[#allocation5 + $0x138] sm:$0xff]  ;;  %v227_v40 = vld [vmem:[#allocation5 + $0x80] sm:$0xff]  ;;  %v855_v42 = vpack.c.bf16 %v241_v31, %v237_v30  ;;  %p1035_p3 = por %p1034_p13, %p1033_p10 }
  0x60   : > { %850 = vmatprep.subr.bf16.mxu1 %v849_v17  ;;  %v801_v39 = vpack.c.bf16 %v232_v37, %v228_v36  ;;  %v231_v41 = vld [vmem:[#allocation5 + $0xa0] sm:$0xff]  ;;  %v245_v43 = vld [vmem:[#allocation5 + $0x110] sm:$0xff]  ;;  %v236_v45 = vld [vmem:[#allocation5 + $0xc8] sm:$0xff]  ;;  %v857_v47 = vpack.c.bf16 %v250_v38, %v246_v35 }
  0x61   : > { %800 = vmatpush1.bf16.msra.mxu0 %v799_v33  ;;  %v803_v44 = vpack.c.bf16 %v231_v41, %v227_v40  ;;  %v240_v46 = vld [vmem:[#allocation5 + $0xe8] sm:$0xff]  ;;  %v249_v48 = vld [vmem:[#allocation5 + $0x130] sm:$0xff]  ;;  %v235_v50 = vld [vmem:[#allocation5 + $0xc0] sm:$0xff]  ;;  %p1036_p7 = pnand %p1035_p3, %p1029_p8 }
  0x62   : > { %802 = vmatprep.subr.bf16.mxu0 %v801_v39  ;;  %v805_v49 = vpack.c.bf16 %v240_v46, %v236_v45  ;;  %v239_v51 = vld [vmem:[#allocation5 + $0xe0] sm:$0xff]  ;;  %v254_v52 = vld [vmem:[#allocation5 + $0x158] sm:$0xff]  ;;  %v244_v54 = vld [vmem:[#allocation5 + $0x108] sm:$0xff]  ;;  %v859_v56 = vpack.c.bf16 %v249_v48, %v245_v43 }
  0x63   : > { %852 = vmatpush1.bf16.msra.mxu1 %v851_v29  ;;  %v258_v53 = vld [vmem:[#allocation5 + $0x178] sm:$0xff]  ;;  %v248_v55 = vld [vmem:[#allocation5 + $0x128] sm:$0xff]  ;;  %v253_v57 = vld [vmem:[#allocation5 + $0x150] sm:$0xff]  ;;  %v807_v59 = vpack.c.bf16 %v239_v51, %v235_v50 }
  0x64   : > { %854 = vmatprep.subr.bf16.mxu1 %v853_v34  ;;  %v257_v58 = vld [vmem:[#allocation5 + $0x170] sm:$0xff]  ;;  %v861_v60 = vpack.c.bf16 %v258_v53, %v254_v52  ;;  %v262_v61 = vld [vmem:[#allocation5 + $0x198] sm:$0xff]  ;;  %v809_v62 = vpack.c.bf16 %v248_v55, %v244_v54  ;;  %v243_v63 = vld [vmem:[#allocation5 + $0x100] sm:$0xff] }
  0x65   : > { %804 = vmatpush1.bf16.msra.mxu0 %v803_v44  ;;  %v247_v0 = vld [vmem:[#allocation5 + $0x120] sm:$0xff]  ;;  %v266_v1 = vld [vmem:[#allocation5 + $0x1b8] sm:$0xff]  ;;  %v252_v2 = vld [vmem:[#allocation5 + $0x148] sm:$0xff]  ;;  %v863_v4 = vpack.c.bf16 %v257_v58, %v253_v57 }
  0x66   : > { %806 = vmatprep.subr.bf16.mxu0 %v805_v49  ;;  %v256_v3 = vld [vmem:[#allocation5 + $0x168] sm:$0xff]  ;;  %v261_v5 = vld [vmem:[#allocation5 + $0x190] sm:$0xff]  ;;  %v811_v7 = vpack.c.bf16 %v247_v0, %v243_v63  ;;  %v865_v8 = vpack.c.bf16 %v266_v1, %v262_v61  ;;  %v270_v9 = vld [vmem:[#allocation5 + $0x1d8] sm:$0xff] }
  0x67   : > { %856 = vmatpush1.bf16.msra.mxu1 %v855_v42  ;;  %v265_v6 = vld [vmem:[#allocation5 + $0x1b0] sm:$0xff]  ;;  %v813_v10 = vpack.c.bf16 %v256_v3, %v252_v2  ;;  %v251_v11 = vld [vmem:[#allocation5 + $0x140] sm:$0xff]  ;;  %v274_v13 = vld [vmem:[#allocation5 + $0x1f8] sm:$0xff] }
  0x68   : > { %858 = vmatprep.subr.bf16.mxu1 %v857_v47  ;;  %v255_v12 = vld [vmem:[#allocation5 + $0x160] sm:$0xff]  ;;  %v260_v14 = vld [vmem:[#allocation5 + $0x188] sm:$0xff]  ;;  %v867_v16 = vpack.c.bf16 %v265_v6, %v261_v5  ;;  %v269_v17 = vld [vmem:[#allocation5 + $0x1d0] sm:$0xff]  ;;  %v869_v20 = vpack.c.bf16 %v274_v13, %v270_v9 }
  0x69   : > { %808 = vmatpush1.bf16.msra.mxu0 %v807_v59  ;;  %v264_v15 = vld [vmem:[#allocation5 + $0x1a8] sm:$0xff]  ;;  %v273_v18 = vld [vmem:[#allocation5 + $0x1f0] sm:$0xff]  ;;  %v815_v19 = vpack.c.bf16 %v255_v12, %v251_v11  ;;  %v278_v21 = vld [vmem:[#allocation5 + $0x218] sm:$0xff] }
  0x6a   : > { %810 = vmatprep.subr.bf16.mxu0 %v809_v62  ;;  %v817_v22 = vpack.c.bf16 %v264_v15, %v260_v14  ;;  %v259_v23 = vld [vmem:[#allocation5 + $0x180] sm:$0xff]  ;;  %v282_v25 = vld [vmem:[#allocation5 + $0x238] sm:$0xff]  ;;  %v268_v26 = vld [vmem:[#allocation5 + $0x1c8] sm:$0xff]  ;;  %v871_v28 = vpack.c.bf16 %v273_v18, %v269_v17 }
  0x6b   : > { %860 = vmatpush1.bf16.msra.mxu1 %v859_v56  ;;  %v263_v24 = vld [vmem:[#allocation5 + $0x1a0] sm:$0xff]  ;;  %v272_v27 = vld [vmem:[#allocation5 + $0x1e8] sm:$0xff]  ;;  %v277_v29 = vld [vmem:[#allocation5 + $0x210] sm:$0xff]  ;;  %v873_v33 = vpack.c.bf16 %v282_v25, %v278_v21 }
  0x6c   : > { %862 = vmatprep.subr.bf16.mxu1 %v861_v60  ;;  %v281_v30 = vld [vmem:[#allocation5 + $0x230] sm:$0xff]  ;;  %v819_v31 = vpack.c.bf16 %v263_v24, %v259_v23  ;;  %v286_v32 = vld [vmem:[#allocation5 + $0x258] sm:$0xff]  ;;  %v821_v35 = vpack.c.bf16 %v272_v27, %v268_v26  ;;  %v267_v36 = vld [vmem:[#allocation5 + $0x1c0] sm:$0xff]  ;;  %v313_v24 = vlaneseq }
  0x6d   : > { %812 = vmatpush1.bf16.msra.mxu0 %v811_v7  ;;  %v290_v34 = vld [vmem:[#allocation5 + $0x278] sm:$0xff]  ;;  %v271_v37 = vld [vmem:[#allocation5 + $0x1e0] sm:$0xff]  ;;  %v276_v38 = vld [vmem:[#allocation5 + $0x208] sm:$0xff]  ;;  %v875_v41 = vpack.c.bf16 %v281_v30, %v277_v29 }
  0x6e   : > { %814 = vmatprep.subr.bf16.mxu0 %v813_v10  ;;  %v280_v39 = vld [vmem:[#allocation5 + $0x228] sm:$0xff]  ;;  %v285_v42 = vld [vmem:[#allocation5 + $0x250] sm:$0xff]  ;;  %v823_v44 = vpack.c.bf16 %v271_v37, %v267_v36  ;;  %v877_v45 = vpack.c.bf16 %v290_v34, %v286_v32  ;;  %v294_v46 = vld [vmem:[#allocation5 + $0x298] sm:$0xff]  ;;  %v1307_v25 = vshrl.u32 %v313_v24, 7 }
  0x6f   : > { %864 = vmatpush1.bf16.msra.mxu1 %v863_v4  ;;  %v1283_v40 = vld [vmem:[%s1272_s9 + $0x8] sm:$0xff]  ;;  %v289_v43 = vld [vmem:[#allocation5 + $0x270] sm:$0xff]  ;;  %v825_v47 = vpack.c.bf16 %v280_v39, %v276_v38  ;;  %v275_v48 = vld [vmem:[#allocation5 + $0x200] sm:$0xff] }
  0x70   : > { %866 = vmatprep.subr.bf16.mxu1 %v865_v8  ;;  %781 = vmatprep.mubr.msk.f32.mxu1 %vm333_vm0, %v1283_v40  ;;  %v279_v49 = vld [vmem:[#allocation5 + $0x220] sm:$0xff]  ;;  %v298_v50 = vld [vmem:[#allocation5 + $0x2b8] sm:$0xff]  ;;  %v284_v51 = vld [vmem:[#allocation5 + $0x248] sm:$0xff]  ;;  %v879_v53 = vpack.c.bf16 %v289_v43, %v285_v42  ;;  %v323_v26 = vsub.s32 2, %v1307_v25  ;;  %v319_v29 = vsub.s32 1, %v1307_v25 }
  0x71   : > { %816 = vmatpush1.bf16.msra.mxu0 %v815_v19  ;;  %779 = vmatprep.mubr.msk.f32.mxu0 %vm333_vm0, %v1283_v40  ;;  %v288_v52 = vld [vmem:[#allocation5 + $0x268] sm:$0xff]  ;;  %v293_v54 = vld [vmem:[#allocation5 + $0x290] sm:$0xff]  ;;  %v827_v56 = vpack.c.bf16 %v279_v49, %v275_v48  ;;  %v881_v57 = vpack.c.bf16 %v298_v50, %v294_v46  ;;  %v302_v58 = vld [vmem:[#allocation5 + $0x2d8] sm:$0xff] }
  0x72   : > { %818 = vmatprep.subr.bf16.mxu0 %v817_v22  ;;  %v297_v55 = vld [vmem:[#allocation5 + $0x2b0] sm:$0xff]  ;;  %v829_v59 = vpack.c.bf16 %v288_v52, %v284_v51  ;;  %v283_v60 = vld [vmem:[#allocation5 + $0x240] sm:$0xff]  ;;  %v306_v62 = vld [vmem:[#allocation5 + $0x2f8] sm:$0xff] }
  0x73   : > { %868 = vmatpush1.bf16.msra.mxu1 %v867_v16  ;;  %v287_v61 = vld [vmem:[#allocation5 + $0x260] sm:$0xff]  ;;  %v292_v63 = vld [vmem:[#allocation5 + $0x288] sm:$0xff]  ;;  %v883_v1 = vpack.c.bf16 %v297_v55, %v293_v54  ;;  %v301_v2 = vld [vmem:[#allocation5 + $0x2d0] sm:$0xff]  ;;  %v885_v4 = vpack.c.bf16 %v306_v62, %v302_v58 }
  0x74   : > { %870 = vmatprep.subr.bf16.mxu1 %v869_v20  ;;  %v296_v0 = vld [vmem:[#allocation5 + $0x2a8] sm:$0xff]  ;;  %v831_v3 = vpack.c.bf16 %v287_v61, %v283_v60  ;;  %v305_v5 = vld [vmem:[#allocation5 + $0x2f0] sm:$0xff]  ;;  %v291_v7 = vld [vmem:[#allocation5 + $0x280] sm:$0xff]  ;;  %v592_v60 = vsel %vm333_vm0, %v1283_v40, 0.0 }
  0x75   : > { %820 = vmatpush1.bf16.msra.mxu0 %v819_v31  ;;  %v833_v6 = vpack.c.bf16 %v296_v0, %v292_v63  ;;  %v295_v8 = vld [vmem:[#allocation5 + $0x2a0] sm:$0xff]  ;;  %v300_v9 = vld [vmem:[#allocation5 + $0x2c8] sm:$0xff]  ;;  %v887_v11 = vpack.c.bf16 %v305_v5, %v301_v2  ;;  %v310_v16 = vld [vmem:[#allocation5 + $0x318] sm:$0xff] }
  0x76   : > { %822 = vmatprep.subr.bf16.mxu0 %v821_v35  ;;  %v304_v10 = vld [vmem:[#allocation5 + $0x2e8] sm:$0xff]  ;;  %v835_v12 = vpack.c.bf16 %v295_v8, %v291_v7  ;;  %v299_v14 = vld [vmem:[#allocation5 + $0x2c0] sm:$0xff]  ;;  %v309_v18 = vld [vmem:[#allocation5 + $0x310] sm:$0xff] }
  0x77   : > { %872 = vmatpush1.bf16.msra.mxu1 %v871_v28  ;;  %v837_v13 = vpack.c.bf16 %v304_v10, %v300_v9  ;;  %v303_v15 = vld [vmem:[#allocation5 + $0x2e0] sm:$0xff]  ;;  %v308_v20 = vld [vmem:[#allocation5 + $0x308] sm:$0xff]  ;;  %v1293_v21 = vld [vmem:[%s1272_s9 + $0x18] sm:$0xff]  ;;  %v327_v28 = vsub.s32 3, %v1307_v25  ;;  %v606_v10 = vand.u32 127, %v313_v24 }
  0x78   : > { %874 = vmatprep.subr.bf16.mxu1 %v873_v33  ;;  %v839_v17 = vpack.c.bf16 %v303_v15, %v299_v14  ;;  %v1290_v19 = vld [vmem:[%s1272_s9] sm:$0xff]  ;;  %v1299_v23 = vld [vmem:[%s1272_s9 + $0x10] sm:$0xff] }
  0x79   : > { %824 = vmatpush1.bf16.msra.mxu0 %v823_v44  ;;  %v307_v22 = vld [vmem:[#allocation5 + $0x300] sm:$0xff]  ;;  %v593_v61 = vadd.f32 %v592_v60, %v1290_v19  ;;  %v609_v15 = vsub.s32 %v606_v10, %v1307_v25 }
  0x7a   : > { %826 = vmatprep.subr.bf16.mxu0 %v825_v47  ;;  %v311_v27 = vld [vmem:[%s1391_s2] sm:$0xf]  ;;  %v315_v47 = vsub.s32 0, %v1307_v25 }
  0x7b   : > { %876 = vmatpush1.bf16.msra.mxu1 %v875_v41  ;;  %v324_v31 = vrot.slane %v311_v27, %v323_v26  ;;  %v328_v33 = vrot.slane %v311_v27, %v327_v28  ;;  %v320_v34 = vrot.slane %v311_v27, %v319_v29 }
  0x7c   : > { %878 = vmatprep.subr.bf16.mxu1 %v877_v45  ;;  %v316_v51 = vrot.slane %v311_v27, %v315_v47 }
  0x7d   : > { %828 = vmatpush1.bf16.msra.mxu0 %v827_v56 }
  0x7e   : > { %830 = vmatprep.subr.bf16.mxu0 %v829_v59 }
  0x7f   : > { %880 = vmatpush1.bf16.msra.mxu1 %v879_v53 }
  0x80   : > { %882 = vmatprep.subr.bf16.mxu1 %v881_v57 }
  0x81   : > { %832 = vmatpush1.bf16.msra.mxu0 %v831_v3 }
  0x82   : > { %834 = vmatprep.subr.bf16.mxu0 %v833_v6  ;;  %v596_v6 = vsel %vm333_vm0, %v1293_v21, 0.0 }
  0x83   : > { %884 = vmatpush1.bf16.msra.mxu1 %v883_v1  ;;  %v597_v9 = vadd.f32 %v596_v6, %v1299_v23 }
  0x84   : > { %886 = vmatprep.subr.bf16.mxu1 %v885_v4 }
  0x85   : > { %836 = vmatpush1.bf16.msra.mxu0 %v835_v12 }
  0x86   : > { %838 = vmatprep.subr.bf16.mxu0 %v837_v13  ;;  %v611_v13 = vadd.s32 4294967288, %v606_v10 }
  0x87   : > { %888 = vmatpush1.bf16.msra.mxu1 %v887_v11 }
  0x88   : > { %465 = vmatprep.subr.mxu1 %v310_v16 }
  0x89   : > { %840 = vmatpush1.bf16.msra.mxu0 %v839_v17  ;;  %v614_v17 = vsub.s32 %v611_v13, %v1307_v25 }
  0x8a   : > { %388 = vmatprep.subr.mxu0 %v308_v20 }
  0x8b   : > { %466 = vmatpush1.msra.mxu1 %v309_v18 }
  0x8c   : > { %482 = vmatmul.mubr.f32.vlgmr.msra.gmra.mrb[0].mxu1 %v1290_v19 }
  0x8d   : > { %782 = vmatprep.mubr.msk.f32.mxu1 %vm333_vm0, %v1293_v21  ;;  %389 = vmatpush1.msra.mxu0 %v307_v22 }
  0x8e   : > { %405 = vmatmul.mubr.f32.vlgmr.msra.gmra.mrb[0].mxu0 %v1290_v19 }
  0x8f   : > { %780 = vmatprep.mubr.msk.f32.mxu0 %vm333_vm0, %v1293_v21 }
  0x90   : > { %488 = vmatmul.mubr.f32.gmra.mrb[2].mxu1 %v1299_v23 }
  0x92   : > { %411 = vmatmul.mubr.f32.gmra.mrb[2].mxu0 %v1299_v23 }
 0x15f   : > { %v483_v30 = vpop.f32.mrb[0].mxu1 }
 0x160   : > { %v485_v32 = vpop.f32.mrb[1].mxu1  ;;  %v484_v37 = vadd.f32 %v483_v30, %v324_v31 }
 0x161   : > { %v406_v36 = vpop.f32.mrb[0].mxu0  ;;  %v486_v42 = vadd.f32 %v485_v32, %v328_v33 }
 0x162   : > { %v408_v41 = vpop.f32.mrb[1].mxu0  ;;  %v407_v53 = vadd.f32 %v406_v36, %v316_v51 }
 0x163   : > { %v489_v35 = vpop.f32.mrb[2].mxu1  ;;  %v409_v44 = vadd.f32 %v408_v41, %v320_v34 }
 0x164   : > { %v490_v38 = vadd.f32 %v489_v35, %v324_v31  ;;  %v491_v39 = vpop.f32.mrb[3].mxu1 }
 0x165   : > { %v492_v43 = vadd.f32 %v491_v39, %v328_v33  ;;  %v412_v48 = vpop.f32.mrb[2].mxu0  ;;  %558 = vmatprep.mubr.f32.mxu0 %v409_v44 }
 0x166   : > { %v891_v45 = vpack.c.bf16 %v490_v38, %v484_v37  ;;  %v414_v49 = vpop.f32.mrb[3].mxu0  ;;  %v413_v52 = vadd.f32 %v412_v48, %v316_v51 }
 0x167   : > { %v889_v46 = vpack.c.bf16 %v492_v43, %v486_v42  ;;  %v415_v50 = vadd.f32 %v414_v49, %v320_v34 }
 0x169   : > { %890 = vmatprep.subr.bf16.mxu0 %v889_v46  ;;  %893 = vmatprep.subr.bf16.mxu1 %v889_v46 }
 0x16a   : > { %892 = vmatpush1.bf16.xpose.msra.mxu0 %v891_v45  ;;  %894 = vmatpush1.bf16.xpose.msra.mxu1 %v891_v45 }
 0x16b   : > { %563 = vmatprep.mubr.f32.mxu1 %v415_v50 }
 0x171   : > { %559 = vmatmul.mubr.f32.vlgmr.msra.gmra.mrb[4].mxu0 %v407_v53  ;;  %564 = vmatmul.mubr.f32.vlgmr.msra.gmra.mrb[4].mxu1 %v413_v52 }
 0x244   : > { %v560_v54 = vpop.f32.mrb[4].mxu0  ;;  %v565_v55 = vpop.f32.mrb[4].mxu1 }
 0x245   : > { %v562_v56 = vpop.f32.mrb[5].mxu0  ;;  %v570_v57 = vsel %vm569_vm1, %v560_v54, -inf  ;;  %v567_v58 = vpop.f32.mrb[5].mxu1  ;;  %v573_v59 = vsel %vm569_vm1, %v565_v55, -inf }
 0x246   : > { %571 = vmax.xlane.f32.xlu0 %v570_v57 }
 0x24a   : > { %574 = vmax.xlane.f32.xlu0 %v573_v59 }
 0x24e   : > { %594 = vadd.xlane.f32.xlu0 %v593_v61 }
 0x2d3   : > { %v572_v62 = vpop.xlane.xlu0 %571 }
 0x2d4   : > { %v576_v63 = vsub.f32 %v560_v54, %v572_v62 }
 0x2d6   : > { %v578_v0 = vmul.f32 1.442695, %v576_v63 }
 0x2d7   : > { %v575_v1 = vpop.xlane.xlu0 %574 }
 0x2d8   : > { %958 = vpow2.f32 %v578_v0  ;;  %v577_v2 = vsub.f32 %v565_v55, %v575_v1 }
 0x2da   : > { %v580_v3 = vmul.f32 1.442695, %v577_v2 }
 0x2db   : > { %v595_v12 = vpop.xlane.xlu0 %594 }
 0x2dc   : > { %960 = vpow2.f32 %v580_v3  ;;  %v601_v16 = vmul.f32 0.005, %v595_v12 }
 0x2de   : > { %v610_v22 = vrot.slane %v601_v16, %v609_v15 }
 0x2e2   : > { %v959_v4 = vpop.eup %958 }
 0x2e3   : > { %v582_v5 = vsel %vm569_vm1, %v959_v4, 0.0 }
 0x2e4   : > { %583 = vadd.xlane.f32.xlu1 %v582_v5 }
 0x2e6   : > { %v961_v7 = vpop.eup %960 }
 0x2e7   : > { %v585_v8 = vsel %vm569_vm1, %v961_v7, 0.0 }
 0x2e8   : > { %586 = vadd.xlane.f32.xlu1 %v585_v8 }
 0x2ec   : > { %598 = vadd.xlane.f32.xlu1 %v597_v9 }
 0x371   : > { %v584_v11 = vpop.xlane.xlu1 %583 }
 0x372   : > { %962 = vrcp.f32 %v584_v11 }
 0x375   : > { %v587_v14 = vpop.xlane.xlu1 %586 }
 0x376   : > { %964 = vrcp.f32 %v587_v14 }
 0x379   : > { %v599_v18 = vpop.xlane.xlu1 %598 }
 0x37a   : > { %v602_v20 = vmul.f32 0.005, %v599_v18 }
 0x37c   : > { %v963_v26 = vpop.eup %962  ;;  %v615_v27 = vrot.slane %v602_v20, %v614_v17 }
 0x37d   : > { %v589_v28 = vmul.f32 %v963_v26, %v959_v4 }
 0x37e   : > { %v617_v29 = vsel %vm616_vm2, %v615_v27, %v610_v22 }
 0x37f   : > { %v631_v24 = vmul.f32 %v617_v29, %v589_v28 }
 0x380   : > { %v965_v30 = vpop.eup %964 }
 0x381   : > { %v633_v31 = vsel %vm569_vm1, %v631_v24, 0.0  ;;  %v591_v32 = vmul.f32 %v965_v30, %v961_v7 }
 0x382   : > { %634 = vadd.xlane.f32.xlu0 %v633_v31 }
 0x383   : > { %v632_v33 = vmul.f32 %v617_v29, %v591_v32 }
 0x385   : > { %v636_v34 = vsel %vm569_vm1, %v632_v33, 0.0 }
 0x386   : > { %637 = vadd.xlane.f32.xlu1 %v636_v34 }
 0x40f   : > { %v635_v35 = vpop.xlane.xlu0 %634 }
 0x413   : > { %v638_v25 = vpop.xlane.xlu1 %637 }
 0x414   : > { %v639_v36 = vmin.f32 %v635_v35, %v638_v25  ;;  %v646_v37 = vmax.f32 %v635_v35, %v638_v25 }
 0x416   : > { %v640_v38 = vrot.slane %v639_v36, 4  ;;  %v647_v39 = vrot.slane %v646_v37, 4 }
 0x418   : > { %v641_v41 = vmin.f32 %v639_v36, %v640_v38  ;;  %v648_v42 = vmax.f32 %v646_v37, %v647_v39 }
 0x41a   : > { %v642_v43 = vrot.slane %v641_v41, 2  ;;  %v649_v44 = vrot.slane %v648_v42, 2 }
 0x41c   : > { %v643_v45 = vmin.f32 %v641_v41, %v642_v43  ;;  %v650_v46 = vmax.f32 %v648_v42, %v649_v44 }
 0x41e   : > { %v644_v47 = vrot.slane %v643_v45, 1  ;;  %v651_v48 = vrot.slane %v650_v46, 1 }
 0x420   : > { %v645_v49 = vmin.f32 %v643_v45, %v644_v47  ;;  %v652_v50 = vmax.f32 %v650_v46, %v651_v48 }
 0x422   : > { %v655_v51 = vsub.f32 %v652_v50, %v645_v49  ;;  %v653_v52 = vsub.f32 %v635_v35, %v645_v49  ;;  %v654_v53 = vsub.f32 %v638_v25, %v645_v49 }
 0x424   : > { %966 = vrcp.f32 %v655_v51 }
 0x42e   : > { %v967_v54 = vpop.eup %966 }
 0x42f   : > { %v657_v55 = vmul.f32 %v967_v54, %v653_v52  ;;  %v658_v56 = vmul.f32 %v967_v54, %v654_v53 }
 0x431   : > { %v659_v57 = vadd.f32 1e-06, %v657_v55  ;;  %v660_v58 = vadd.f32 1e-06, %v658_v56 }
 0x433   : > { %v661_v59 = vmul.f32 %v659_v57, %v1290_v19  ;;  %v662_v60 = vmul.f32 %v659_v57, %v1283_v40  ;;  %v663_v61 = vmul.f32 %v660_v58, %v1299_v23  ;;  %v664_v62 = vmul.f32 %v660_v58, %v1293_v21 }
 0x435   : > { %665 = vst [vmem:[%s204_s4] sm:$0xff] %v661_v59  ;;  %666 = vst.msk [vmem:[%s204_s4 + $0x8] sm:$0xff] %vm333_vm0, %v662_v60 }
 0x436   : > { %667 = vst [vmem:[%s204_s4 + $0x10] sm:$0xff] %v663_v61  ;;  %668 = vst.msk [vmem:[%s204_s4 + $0x18] sm:$0xff] %vm333_vm0, %v664_v62 }
 0x437   : > { %1039 = shalt.err (!%p1036_p7)
}
 0x438   : > { %s1040_s30 = scalar_lea.hbm %s1339_s11, 512  ;;  %s1044_s8 = scalar_lea.hbm %s1392_s3, 1024 }
 0x439   : > { %p1041_p9 = scmp.ne.s32.totalorder %s1339_s11, %s1040_s30  ;;  %p1045_p5 = scmp.lt.u32.totalorder %s1339_s11, %s1392_s3 }
 0x43a   : > { %p1046_p11 = scmp.lt.u32.totalorder %s1044_s8, %s1040_s30  ;;  %p1048_p4 = scmp.lt.u32.totalorder %s1040_s30, %s1339_s11 }
 0x43b   : > { %p1042_p2 = pnand %p1041_p9, %p1218_p12 }
 0x43c   : > { %p1047_p1 = por %p1046_p11, %p1045_p5 }
 0x43d   : > { %p1043_p0 = pneg %p1042_p2 }
 0x43e   : > { %p1049_p6 = por %p1048_p4, %p1047_p1 }
 0x440   : > { %p1050_p8 = pnand %p1049_p6, %p1043_p0 }
 0x442   : > { %1053 = shalt.err (!%p1050_p8)
}
 0x443   : > { %s1105_s20 = smov 256   ;;  %s1106_s4 = smov 16  }
 0x444   : > { %901 = dma.vmem_to_hbm [thread:$0]  (%p1218_p12), %s1334_s25, 512, %s1339_s11, %s670_s16, %s1105_s20, %s1105_s20, %s1106_s4  }
 0x445 PF: > { %s699_s26 = sand.u32 1, %s1084_s12   ;;  %p1407_p10 = scmp.ne.s32.totalorder %s1397_s19, 0 }
 0x446   : > { %p1408_p13 = scmp.ge.s32.totalorder %s1096_s15, 2  ;;  %s700_s5 = scalar_lea.sflag [#allocation4], %s699_s26 }
 0x448   : > { %p912_p3 = pnand %p1408_p13, %p1407_p10 }
 0x44a   : > { %1079 = dma.done.wait (!%p912_p3), %s700_s5, 512  }
 0x44b   : > { %1081 = vsyncadd (!%p912_p3), %s700_s5, 4294966784  ;;  %p17_p7 = scmp.ge.s32.totalorder %s1183_s24, 4   ;;  %s1409_s12 = smov %s1088_s13 }
 0x44c   : > { %s1410_s13 = smov %s1092_s14  ;;  %s1411_s14 = smov %s1214_s17 }
 0x44d   : > { %s1412_s15 = smov %s1183_s24  ;;  %19 = sbr.rel (!%p17_p7) target bundleno = 6 (0x6), region = 81 }
 0x454   :  { %705 = vsyncpa [#allocation3], 1 }
 0x455   :  { %707 = vsyncpa [#allocation3 + $0x1], 1 }
 0x456   :  { %708 = vsyncpa [#allocation6], 1 }
 0x457   :  { %709 = vsyncpa [#allocation4], 1 }
 0x458   :  { %711 = vsyncpa [#allocation4 + $0x1], 1 }

</bundles_post_ra>
